<compile_context>
chip_gen: v6e
topology: v6e:2x2x1
jax: 0.10.0
libtpu: 0.0.40
codegen_flags: <defaults>
</compile_context>

<pallas_src>
import math
import jax
import jax.numpy as jnp
from jax import lax
from jax.experimental import pallas as pl
from jax.experimental.pallas import tpu as pltpu

# ---------------- model dims (small, consistent with the module) -----------
B = 2          # batch
S = 8          # seq_len
H = 32         # hidden_dim
NH = 4         # num_heads
HD = H // NH   # head_dim
FF = 4 * H     # feed-forward hidden (=128, lane-full)
EPS = 1e-5     # nn.LayerNorm default eps
BS = B * S     # flattened (batch, seq) rows


def _layernorm(x, gamma, beta):
    mu = jnp.mean(x, axis=-1, keepdims=True)
    var = jnp.mean((x - mu) ** 2, axis=-1, keepdims=True)
    return (x - mu) * lax.rsqrt(var + EPS) * gamma + beta


def transformer_layer_kernel(
    x_ref,      # (BS, H)    flattened input (residual path + projections)
    bias_ref,   # (B, S, S)  structure bias
    wqkv_ref,   # (H, 3H)    fused Q|K|V projection weight
    wo_ref,     # (H, H)     output projection weight
    w1_ref,     # (H, FF)    FFN in
    w2_ref,     # (FF, H)    FFN out
    p_ref,      # (8, 128)   packed small vectors, see wrapper for row layout
    out_ref,    # (BS, H)
    ctx_ref,    # (BS, H)    VMEM scratch: lane-packed per-head attn context
):
    f32 = jnp.float32
    x = x_ref[...]                        # (16, 32)
    pv = p_ref[...]                       # (8, 128)
    bqkv = pv[0:1, 0:3 * H]               # (1, 96)
    bo   = pv[1:2, 0:H]                   # (1, 32)
    g1   = pv[2:3, 0:H]
    be1  = pv[3:4, 0:H]
    b1   = pv[4:5, 0:FF]                  # (1, 128)
    b2   = pv[5:6, 0:H]
    g2   = pv[6:7, 0:H]
    be2  = pv[7:8, 0:H]

    # ---- fused QKV projection: one (16,32)x(32,96) MXU push ---------------
    qkv = jnp.dot(x, wqkv_ref[...], preferred_element_type=f32) + bqkv

    # ---- per-(batch, head) attention on 8x8 tiles; exact softmax ----------
    scale = 1.0 / math.sqrt(HD)
    for b in range(B):
        bias_b = bias_ref[b]                               # (S, S)
        r0, r1 = b * S, (b + 1) * S
        for n in range(NH):
            c0, c1 = n * HD, (n + 1) * HD
            qs = qkv[r0:r1, c0:c1]                         # (8, 8)
            ks = qkv[r0:r1, H + c0:H + c1]                 # (8, 8)
            vs = qkv[r0:r1, 2 * H + c0:2 * H + c1]         # (8, 8)
            sc = lax.dot_general(qs, ks, (((1,), (1,)), ((), ())),
                                 preferred_element_type=f32) * scale + bias_b
            sc = sc - jnp.max(sc, axis=-1, keepdims=True)
            p = jnp.exp(sc)
            p = p / jnp.sum(p, axis=-1, keepdims=True)     # exact division
            ctx_ref[r0:r1, c0:c1] = jnp.dot(p, vs, preferred_element_type=f32)

    # ---- output projection with original Wo: one (16,32)x(32,32) push -----
    attended = jnp.dot(ctx_ref[...], wo_ref[...], preferred_element_type=f32) + bo

    # TODO(synk): dropout layers are identity here (eval mode), so omitted.

    # ---- residual + LayerNorm 1 --------------------------------------------
    y = _layernorm(x + attended, g1, be1)

    # ---- FFN: (16,32)x(32,128) -> ReLU -> (16,128)x(128,32) ----------------
    h1 = jnp.maximum(jnp.dot(y, w1_ref[...], preferred_element_type=f32) + b1, 0.0)
    ff = jnp.dot(h1, w2_ref[...], preferred_element_type=f32) + b2

    # ---- residual + LayerNorm 2 --------------------------------------------
    out_ref[...] = _layernorm(y + ff, g2, be2).astype(out_ref.dtype)


def transformer_layer(x, structure_bias, params):
    """x: (B, S, H) f32, structure_bias: (B, S, S) f32, params: tuple of weights."""
    (wq, bq, wk, bk, wv, bv, wo, bo,
     g1, be1, w1, b1, w2, b2, g2, be2) = params

    # ---- wrapper-side packing: fused QKV weight + one (8,128) param slab ---
    wqkv = jnp.concatenate([wq, wk, wv], axis=1)           # (H, 3H) = (32, 96)
    bqkv = jnp.concatenate([bq, bk, bv], axis=1)           # (1, 96)

    pvec = jnp.zeros((8, 128), jnp.float32)
    pvec = pvec.at[0, 0:3 * H].set(bqkv[0])
    pvec = pvec.at[1, 0:H].set(bo[0])
    pvec = pvec.at[2, 0:H].set(g1[0])
    pvec = pvec.at[3, 0:H].set(be1[0])
    pvec = pvec.at[4, 0:FF].set(b1[0])
    pvec = pvec.at[5, 0:H].set(b2[0])
    pvec = pvec.at[6, 0:H].set(g2[0])
    pvec = pvec.at[7, 0:H].set(be2[0])

    x2d = x.reshape(BS, H)

    vmem = pl.BlockSpec(memory_space=pltpu.MemorySpace.VMEM)
    out2d = pl.pallas_call(
        transformer_layer_kernel,
        out_shape=jax.ShapeDtypeStruct((BS, H), jnp.float32),
        in_specs=[vmem] * 7,
        out_specs=vmem,
        scratch_shapes=[pltpu.VMEM((BS, H), jnp.float32)],
    )(x2d, structure_bias, wqkv, wo, w1, w2, pvec)

    return out2d.reshape(B, S, H)


def reference(x, sbias, params):
    """Plain-JAX reference with identical semantics (dropout = identity)."""
    (wq, bq, wk, bk, wv, bv, wo, bo,
     g1, be1, w1, b1, w2, b2, g2, be2) = params
    with jax.default_matmul_precision("highest"):
        q = x @ wq + bq
        k = x @ wk + bk
        v = x @ wv + bv
        q = q.reshape(B, S, NH, HD).transpose(0, 2, 1, 3)
        k = k.reshape(B, S, NH, HD).transpose(0, 2, 1, 3)
        v = v.reshape(B, S, NH, HD).transpose(0, 2, 1, 3)
        scores = jnp.einsum('bhqd,bhkd->bhqk', q, k) / math.sqrt(HD)
        scores = scores + sbias[:, None, :, :]
        attn = jax.nn.softmax(scores, axis=-1)
        out = jnp.einsum('bhqk,bhkd->bhqd', attn, v)
        out = out.transpose(0, 2, 1, 3).reshape(B, S, H)
        attended = out @ wo + bo

        def ln(t, g, b):
            mu = jnp.mean(t, axis=-1, keepdims=True)
            var = jnp.mean((t - mu) ** 2, axis=-1, keepdims=True)
            return (t - mu) / jnp.sqrt(var + EPS) * g + b

        y = ln(x + attended, g1, be1)
        ff = jnp.maximum(y @ w1 + b1, 0.0) @ w2 + b2
        return ln(y + ff, g2, be2)


def init_params(key):
    ks = jax.random.split(key, 12)
    sc = 0.1
    wq = jax.random.normal(ks[0], (H, H), jnp.float32) * sc
    bq = jax.random.normal(ks[1], (1, H), jnp.float32) * sc
    wk = jax.random.normal(ks[2], (H, H), jnp.float32) * sc
    bk = jax.random.normal(ks[3], (1, H), jnp.float32) * sc
    wv = jax.random.normal(ks[4], (H, H), jnp.float32) * sc
    bv = jax.random.normal(ks[5], (1, H), jnp.float32) * sc
    wo = jax.random.normal(ks[6], (H, H), jnp.float32) * sc
    bo = jax.random.normal(ks[7], (1, H), jnp.float32) * sc
    g1 = jnp.ones((1, H), jnp.float32)
    be1 = jnp.zeros((1, H), jnp.float32)
    w1 = jax.random.normal(ks[8], (H, FF), jnp.float32) * sc
    b1 = jax.random.normal(ks[9], (1, FF), jnp.float32) * sc
    w2 = jax.random.normal(ks[10], (FF, H), jnp.float32) * sc
    b2 = jax.random.normal(ks[11], (1, H), jnp.float32) * sc
    g2 = jnp.ones((1, H), jnp.float32)
    be2 = jnp.zeros((1, H), jnp.float32)
    return (wq, bq, wk, bk, wv, bv, wo, bo,
            g1, be1, w1, b1, w2, b2, g2, be2)


if __name__ == "__main__":
    key = jax.random.PRNGKey(0)
    kx, kb, kp = jax.random.split(key, 3)
    x = jax.random.normal(kx, (B, S, H), jnp.float32)
    structure_bias = jax.random.normal(kb, (B, S, S), jnp.float32) * 0.1
    params = init_params(kp)

    fn = jax.jit(lambda xx, bb: transformer_layer(xx, bb, params))
    out = jax.block_until_ready(fn(x, structure_bias))

    ref = reference(x, structure_bias, params)
    assert out.shape == (B, S, H)
    # Exact softmax division (no approx reciprocal) keeps the kernel/reference
    # difference far below this tolerance.
    assert jnp.allclose(out, ref, atol=5e-4, rtol=5e-4), float(jnp.max(jnp.abs(out - ref)))
    print("KERNEL_OK")
</pallas_src>

<mosaic_0001>
module attributes {stable_mosaic.version = 11 : i64} {
  func.func @transformer_layer_kernel(%arg0: memref<16x32xf32, #tpu.memory_space<vmem>>, %arg1: memref<2x8x8xf32, #tpu.memory_space<vmem>>, %arg2: memref<32x96xf32, #tpu.memory_space<vmem>>, %arg3: memref<32x32xf32, #tpu.memory_space<vmem>>, %arg4: memref<32x128xf32, #tpu.memory_space<vmem>>, %arg5: memref<128x32xf32, #tpu.memory_space<vmem>>, %arg6: memref<8x128xf32, #tpu.memory_space<vmem>>, %arg7: memref<16x32xf32, #tpu.memory_space<vmem>>, %arg8: memref<16x32xf32, #tpu.memory_space<vmem>>) attributes {dimension_semantics = [], scalar_prefetch = 0 : i64, scratch_operands = 1 : i64, tpu.core_type = #tpu.core_type<tc>} {
    %c0 = arith.constant 0 : index
    %c0_0 = arith.constant 0 : index
    %0 = vector.load %arg0[%c0, %c0_0] : memref<16x32xf32, #tpu.memory_space<vmem>>, vector<16x32xf32>
    %c0_1 = arith.constant 0 : index
    %c0_2 = arith.constant 0 : index
    %1 = vector.load %arg6[%c0_1, %c0_2] : memref<8x128xf32, #tpu.memory_space<vmem>>, vector<8x128xf32>
    %2 = vector.extract_strided_slice %1 {offsets = [0, 0], sizes = [1, 96], strides = [1, 1]} : vector<8x128xf32> to vector<1x96xf32>
    %3 = vector.extract_strided_slice %1 {offsets = [1, 0], sizes = [1, 32], strides = [1, 1]} : vector<8x128xf32> to vector<1x32xf32>
    %4 = vector.extract_strided_slice %1 {offsets = [2, 0], sizes = [1, 32], strides = [1, 1]} : vector<8x128xf32> to vector<1x32xf32>
    %5 = vector.extract_strided_slice %1 {offsets = [3, 0], sizes = [1, 32], strides = [1, 1]} : vector<8x128xf32> to vector<1x32xf32>
    %6 = vector.extract_strided_slice %1 {offsets = [4, 0], sizes = [1, 128], strides = [1, 1]} : vector<8x128xf32> to vector<1x128xf32>
    %7 = vector.extract_strided_slice %1 {offsets = [5, 0], sizes = [1, 32], strides = [1, 1]} : vector<8x128xf32> to vector<1x32xf32>
    %8 = vector.extract_strided_slice %1 {offsets = [6, 0], sizes = [1, 32], strides = [1, 1]} : vector<8x128xf32> to vector<1x32xf32>
    %9 = vector.extract_strided_slice %1 {offsets = [7, 0], sizes = [1, 32], strides = [1, 1]} : vector<8x128xf32> to vector<1x32xf32>
    %c0_3 = arith.constant 0 : index
    %c0_4 = arith.constant 0 : index
    %10 = vector.load %arg2[%c0_3, %c0_4] : memref<32x96xf32, #tpu.memory_space<vmem>>, vector<32x96xf32>
    %cst = arith.constant dense<0.000000e+00> : vector<16x96xf32>
    %11 = tpu.matmul %0, %10, %cst {dimension_numbers = #tpu.dot_dimension_numbers<[1], [0], [0], [1], [0, 0, 1, 1], [], []>} : vector<16x32xf32>, vector<32x96xf32>, vector<16x96xf32> -> vector<16x96xf32>
    %12 = vector.broadcast %2 : vector<1x96xf32> to vector<16x96xf32>
    %13 = arith.addf %11, %12 : vector<16x96xf32>
    %c0_5 = arith.constant 0 : index
    %c0_6 = arith.constant 0 : index
    %c0_7 = arith.constant 0 : index
    %14 = vector.load %arg1[%c0_5, %c0_6, %c0_7] : memref<2x8x8xf32, #tpu.memory_space<vmem>>, vector<1x8x8xf32>
    %15 = vector.shape_cast %14 : vector<1x8x8xf32> to vector<8x8xf32>
    %16 = vector.extract_strided_slice %13 {offsets = [0, 0], sizes = [8, 8], strides = [1, 1]} : vector<16x96xf32> to vector<8x8xf32>
    %17 = vector.extract_strided_slice %13 {offsets = [0, 32], sizes = [8, 8], strides = [1, 1]} : vector<16x96xf32> to vector<8x8xf32>
    %18 = vector.extract_strided_slice %13 {offsets = [0, 64], sizes = [8, 8], strides = [1, 1]} : vector<16x96xf32> to vector<8x8xf32>
    %cst_8 = arith.constant dense<0.000000e+00> : vector<8x8xf32>
    %19 = tpu.matmul %16, %17, %cst_8 {dimension_numbers = #tpu.dot_dimension_numbers<[1], [1], [0], [0], [0, 0, 1, 0], [], []>} : vector<8x8xf32>, vector<8x8xf32>, vector<8x8xf32> -> vector<8x8xf32>
    %cst_9 = arith.constant 0.353553385 : f32
    %20 = vector.broadcast %cst_9 : f32 to vector<8x8xf32>
    %21 = arith.mulf %19, %20 : vector<8x8xf32>
    %22 = arith.addf %21, %15 : vector<8x8xf32>
    %cst_10 = arith.constant dense<0xFF800000> : vector<8xf32>
    %23 = vector.multi_reduction <maximumf>, %22, %cst_10 [1] : vector<8x8xf32> to vector<8xf32>
    %24 = vector.shape_cast %23 : vector<8xf32> to vector<8x1xf32>
    %25 = vector.broadcast %24 : vector<8x1xf32> to vector<8x8xf32>
    %26 = arith.subf %22, %25 : vector<8x8xf32>
    %27 = math.exp %26 : vector<8x8xf32>
    %cst_11 = arith.constant dense<0.000000e+00> : vector<8xf32>
    %28 = vector.multi_reduction <add>, %27, %cst_11 [1] : vector<8x8xf32> to vector<8xf32>
    %29 = vector.shape_cast %28 : vector<8xf32> to vector<8x1xf32>
    %30 = vector.broadcast %29 : vector<8x1xf32> to vector<8x8xf32>
    %31 = arith.divf %27, %30 : vector<8x8xf32>
    %cst_12 = arith.constant dense<0.000000e+00> : vector<8x8xf32>
    %32 = tpu.matmul %31, %18, %cst_12 {dimension_numbers = #tpu.dot_dimension_numbers<[1], [0], [0], [1], [0, 0, 1, 1], [], []>} : vector<8x8xf32>, vector<8x8xf32>, vector<8x8xf32> -> vector<8x8xf32>
    %c0_13 = arith.constant 0 : index
    %c0_14 = arith.constant 0 : index
    %33 = vector.load %arg8[%c0_13, %c0_14] : memref<16x32xf32, #tpu.memory_space<vmem>>, vector<8x8xf32>
    tpu.vector_store %arg8[%c0_13, %c0_14], %32 {strides = array<i32>} : memref<16x32xf32, #tpu.memory_space<vmem>>, vector<8x8xf32>,
    %34 = vector.extract_strided_slice %13 {offsets = [0, 8], sizes = [8, 8], strides = [1, 1]} : vector<16x96xf32> to vector<8x8xf32>
    %35 = vector.extract_strided_slice %13 {offsets = [0, 40], sizes = [8, 8], strides = [1, 1]} : vector<16x96xf32> to vector<8x8xf32>
    %36 = vector.extract_strided_slice %13 {offsets = [0, 72], sizes = [8, 8], strides = [1, 1]} : vector<16x96xf32> to vector<8x8xf32>
    %cst_15 = arith.constant dense<0.000000e+00> : vector<8x8xf32>
    %37 = tpu.matmul %34, %35, %cst_15 {dimension_numbers = #tpu.dot_dimension_numbers<[1], [1], [0], [0], [0, 0, 1, 0], [], []>} : vector<8x8xf32>, vector<8x8xf32>, vector<8x8xf32> -> vector<8x8xf32>
    %cst_16 = arith.constant 0.353553385 : f32
    %38 = vector.broadcast %cst_16 : f32 to vector<8x8xf32>
    %39 = arith.mulf %37, %38 : vector<8x8xf32>
    %40 = arith.addf %39, %15 : vector<8x8xf32>
    %cst_17 = arith.constant dense<0xFF800000> : vector<8xf32>
    %41 = vector.multi_reduction <maximumf>, %40, %cst_17 [1] : vector<8x8xf32> to vector<8xf32>
    %42 = vector.shape_cast %41 : vector<8xf32> to vector<8x1xf32>
    %43 = vector.broadcast %42 : vector<8x1xf32> to vector<8x8xf32>
    %44 = arith.subf %40, %43 : vector<8x8xf32>
    %45 = math.exp %44 : vector<8x8xf32>
    %cst_18 = arith.constant dense<0.000000e+00> : vector<8xf32>
    %46 = vector.multi_reduction <add>, %45, %cst_18 [1] : vector<8x8xf32> to vector<8xf32>
    %47 = vector.shape_cast %46 : vector<8xf32> to vector<8x1xf32>
    %48 = vector.broadcast %47 : vector<8x1xf32> to vector<8x8xf32>
    %49 = arith.divf %45, %48 : vector<8x8xf32>
    %cst_19 = arith.constant dense<0.000000e+00> : vector<8x8xf32>
    %50 = tpu.matmul %49, %36, %cst_19 {dimension_numbers = #tpu.dot_dimension_numbers<[1], [0], [0], [1], [0, 0, 1, 1], [], []>} : vector<8x8xf32>, vector<8x8xf32>, vector<8x8xf32> -> vector<8x8xf32>
    %c0_20 = arith.constant 0 : index
    %c8 = arith.constant 8 : index
    %51 = vector.load %arg8[%c0_20, %c8] : memref<16x32xf32, #tpu.memory_space<vmem>>, vector<8x8xf32>
    tpu.vector_store %arg8[%c0_20, %c8], %50 {strides = array<i32>} : memref<16x32xf32, #tpu.memory_space<vmem>>, vector<8x8xf32>,
    %52 = vector.extract_strided_slice %13 {offsets = [0, 16], sizes = [8, 8], strides = [1, 1]} : vector<16x96xf32> to vector<8x8xf32>
    %53 = vector.extract_strided_slice %13 {offsets = [0, 48], sizes = [8, 8], strides = [1, 1]} : vector<16x96xf32> to vector<8x8xf32>
    %54 = vector.extract_strided_slice %13 {offsets = [0, 80], sizes = [8, 8], strides = [1, 1]} : vector<16x96xf32> to vector<8x8xf32>
    %cst_21 = arith.constant dense<0.000000e+00> : vector<8x8xf32>
    %55 = tpu.matmul %52, %53, %cst_21 {dimension_numbers = #tpu.dot_dimension_numbers<[1], [1], [0], [0], [0, 0, 1, 0], [], []>} : vector<8x8xf32>, vector<8x8xf32>, vector<8x8xf32> -> vector<8x8xf32>
    %cst_22 = arith.constant 0.353553385 : f32
    %56 = vector.broadcast %cst_22 : f32 to vector<8x8xf32>
    %57 = arith.mulf %55, %56 : vector<8x8xf32>
    %58 = arith.addf %57, %15 : vector<8x8xf32>
    %cst_23 = arith.constant dense<0xFF800000> : vector<8xf32>
    %59 = vector.multi_reduction <maximumf>, %58, %cst_23 [1] : vector<8x8xf32> to vector<8xf32>
    %60 = vector.shape_cast %59 : vector<8xf32> to vector<8x1xf32>
    %61 = vector.broadcast %60 : vector<8x1xf32> to vector<8x8xf32>
    %62 = arith.subf %58, %61 : vector<8x8xf32>
    %63 = math.exp %62 : vector<8x8xf32>
    %cst_24 = arith.constant dense<0.000000e+00> : vector<8xf32>
    %64 = vector.multi_reduction <add>, %63, %cst_24 [1] : vector<8x8xf32> to vector<8xf32>
    %65 = vector.shape_cast %64 : vector<8xf32> to vector<8x1xf32>
    %66 = vector.broadcast %65 : vector<8x1xf32> to vector<8x8xf32>
    %67 = arith.divf %63, %66 : vector<8x8xf32>
    %cst_25 = arith.constant dense<0.000000e+00> : vector<8x8xf32>
    %68 = tpu.matmul %67, %54, %cst_25 {dimension_numbers = #tpu.dot_dimension_numbers<[1], [0], [0], [1], [0, 0, 1, 1], [], []>} : vector<8x8xf32>, vector<8x8xf32>, vector<8x8xf32> -> vector<8x8xf32>
    %c0_26 = arith.constant 0 : index
    %c16 = arith.constant 16 : index
    %69 = vector.load %arg8[%c0_26, %c16] : memref<16x32xf32, #tpu.memory_space<vmem>>, vector<8x8xf32>
    tpu.vector_store %arg8[%c0_26, %c16], %68 {strides = array<i32>} : memref<16x32xf32, #tpu.memory_space<vmem>>, vector<8x8xf32>,
    %70 = vector.extract_strided_slice %13 {offsets = [0, 24], sizes = [8, 8], strides = [1, 1]} : vector<16x96xf32> to vector<8x8xf32>
    %71 = vector.extract_strided_slice %13 {offsets = [0, 56], sizes = [8, 8], strides = [1, 1]} : vector<16x96xf32> to vector<8x8xf32>
    %72 = vector.extract_strided_slice %13 {offsets = [0, 88], sizes = [8, 8], strides = [1, 1]} : vector<16x96xf32> to vector<8x8xf32>
    %cst_27 = arith.constant dense<0.000000e+00> : vector<8x8xf32>
    %73 = tpu.matmul %70, %71, %cst_27 {dimension_numbers = #tpu.dot_dimension_numbers<[1], [1], [0], [0], [0, 0, 1, 0], [], []>} : vector<8x8xf32>, vector<8x8xf32>, vector<8x8xf32> -> vector<8x8xf32>
    %cst_28 = arith.constant 0.353553385 : f32
    %74 = vector.broadcast %cst_28 : f32 to vector<8x8xf32>
    %75 = arith.mulf %73, %74 : vector<8x8xf32>
    %76 = arith.addf %75, %15 : vector<8x8xf32>
    %cst_29 = arith.constant dense<0xFF800000> : vector<8xf32>
    %77 = vector.multi_reduction <maximumf>, %76, %cst_29 [1] : vector<8x8xf32> to vector<8xf32>
    %78 = vector.shape_cast %77 : vector<8xf32> to vector<8x1xf32>
    %79 = vector.broadcast %78 : vector<8x1xf32> to vector<8x8xf32>
    %80 = arith.subf %76, %79 : vector<8x8xf32>
    %81 = math.exp %80 : vector<8x8xf32>
    %cst_30 = arith.constant dense<0.000000e+00> : vector<8xf32>
    %82 = vector.multi_reduction <add>, %81, %cst_30 [1] : vector<8x8xf32> to vector<8xf32>
    %83 = vector.shape_cast %82 : vector<8xf32> to vector<8x1xf32>
    %84 = vector.broadcast %83 : vector<8x1xf32> to vector<8x8xf32>
    %85 = arith.divf %81, %84 : vector<8x8xf32>
    %cst_31 = arith.constant dense<0.000000e+00> : vector<8x8xf32>
    %86 = tpu.matmul %85, %72, %cst_31 {dimension_numbers = #tpu.dot_dimension_numbers<[1], [0], [0], [1], [0, 0, 1, 1], [], []>} : vector<8x8xf32>, vector<8x8xf32>, vector<8x8xf32> -> vector<8x8xf32>
    %c0_32 = arith.constant 0 : index
    %c24 = arith.constant 24 : index
    %87 = vector.load %arg8[%c0_32, %c24] : memref<16x32xf32, #tpu.memory_space<vmem>>, vector<8x8xf32>
    tpu.vector_store %arg8[%c0_32, %c24], %86 {strides = array<i32>} : memref<16x32xf32, #tpu.memory_space<vmem>>, vector<8x8xf32>,
    %c1 = arith.constant 1 : index
    %c0_33 = arith.constant 0 : index
    %c0_34 = arith.constant 0 : index
    %88 = vector.load %arg1[%c1, %c0_33, %c0_34] : memref<2x8x8xf32, #tpu.memory_space<vmem>>, vector<1x8x8xf32>
    %89 = vector.shape_cast %88 : vector<1x8x8xf32> to vector<8x8xf32>
    %90 = vector.extract_strided_slice %13 {offsets = [8, 0], sizes = [8, 8], strides = [1, 1]} : vector<16x96xf32> to vector<8x8xf32>
    %91 = vector.extract_strided_slice %13 {offsets = [8, 32], sizes = [8, 8], strides = [1, 1]} : vector<16x96xf32> to vector<8x8xf32>
    %92 = vector.extract_strided_slice %13 {offsets = [8, 64], sizes = [8, 8], strides = [1, 1]} : vector<16x96xf32> to vector<8x8xf32>
    %cst_35 = arith.constant dense<0.000000e+00> : vector<8x8xf32>
    %93 = tpu.matmul %90, %91, %cst_35 {dimension_numbers = #tpu.dot_dimension_numbers<[1], [1], [0], [0], [0, 0, 1, 0], [], []>} : vector<8x8xf32>, vector<8x8xf32>, vector<8x8xf32> -> vector<8x8xf32>
    %cst_36 = arith.constant 0.353553385 : f32
    %94 = vector.broadcast %cst_36 : f32 to vector<8x8xf32>
    %95 = arith.mulf %93, %94 : vector<8x8xf32>
    %96 = arith.addf %95, %89 : vector<8x8xf32>
    %cst_37 = arith.constant dense<0xFF800000> : vector<8xf32>
    %97 = vector.multi_reduction <maximumf>, %96, %cst_37 [1] : vector<8x8xf32> to vector<8xf32>
    %98 = vector.shape_cast %97 : vector<8xf32> to vector<8x1xf32>
    %99 = vector.broadcast %98 : vector<8x1xf32> to vector<8x8xf32>
    %100 = arith.subf %96, %99 : vector<8x8xf32>
    %101 = math.exp %100 : vector<8x8xf32>
    %cst_38 = arith.constant dense<0.000000e+00> : vector<8xf32>
    %102 = vector.multi_reduction <add>, %101, %cst_38 [1] : vector<8x8xf32> to vector<8xf32>
    %103 = vector.shape_cast %102 : vector<8xf32> to vector<8x1xf32>
    %104 = vector.broadcast %103 : vector<8x1xf32> to vector<8x8xf32>
    %105 = arith.divf %101, %104 : vector<8x8xf32>
    %cst_39 = arith.constant dense<0.000000e+00> : vector<8x8xf32>
    %106 = tpu.matmul %105, %92, %cst_39 {dimension_numbers = #tpu.dot_dimension_numbers<[1], [0], [0], [1], [0, 0, 1, 1], [], []>} : vector<8x8xf32>, vector<8x8xf32>, vector<8x8xf32> -> vector<8x8xf32>
    %c8_40 = arith.constant 8 : index
    %c0_41 = arith.constant 0 : index
    %107 = vector.load %arg8[%c8_40, %c0_41] : memref<16x32xf32, #tpu.memory_space<vmem>>, vector<8x8xf32>
    tpu.vector_store %arg8[%c8_40, %c0_41], %106 {strides = array<i32>} : memref<16x32xf32, #tpu.memory_space<vmem>>, vector<8x8xf32>,
    %108 = vector.extract_strided_slice %13 {offsets = [8, 8], sizes = [8, 8], strides = [1, 1]} : vector<16x96xf32> to vector<8x8xf32>
    %109 = vector.extract_strided_slice %13 {offsets = [8, 40], sizes = [8, 8], strides = [1, 1]} : vector<16x96xf32> to vector<8x8xf32>
    %110 = vector.extract_strided_slice %13 {offsets = [8, 72], sizes = [8, 8], strides = [1, 1]} : vector<16x96xf32> to vector<8x8xf32>
    %cst_42 = arith.constant dense<0.000000e+00> : vector<8x8xf32>
    %111 = tpu.matmul %108, %109, %cst_42 {dimension_numbers = #tpu.dot_dimension_numbers<[1], [1], [0], [0], [0, 0, 1, 0], [], []>} : vector<8x8xf32>, vector<8x8xf32>, vector<8x8xf32> -> vector<8x8xf32>
    %cst_43 = arith.constant 0.353553385 : f32
    %112 = vector.broadcast %cst_43 : f32 to vector<8x8xf32>
    %113 = arith.mulf %111, %112 : vector<8x8xf32>
    %114 = arith.addf %113, %89 : vector<8x8xf32>
    %cst_44 = arith.constant dense<0xFF800000> : vector<8xf32>
    %115 = vector.multi_reduction <maximumf>, %114, %cst_44 [1] : vector<8x8xf32> to vector<8xf32>
    %116 = vector.shape_cast %115 : vector<8xf32> to vector<8x1xf32>
    %117 = vector.broadcast %116 : vector<8x1xf32> to vector<8x8xf32>
    %118 = arith.subf %114, %117 : vector<8x8xf32>
    %119 = math.exp %118 : vector<8x8xf32>
    %cst_45 = arith.constant dense<0.000000e+00> : vector<8xf32>
    %120 = vector.multi_reduction <add>, %119, %cst_45 [1] : vector<8x8xf32> to vector<8xf32>
    %121 = vector.shape_cast %120 : vector<8xf32> to vector<8x1xf32>
    %122 = vector.broadcast %121 : vector<8x1xf32> to vector<8x8xf32>
    %123 = arith.divf %119, %122 : vector<8x8xf32>
    %cst_46 = arith.constant dense<0.000000e+00> : vector<8x8xf32>
    %124 = tpu.matmul %123, %110, %cst_46 {dimension_numbers = #tpu.dot_dimension_numbers<[1], [0], [0], [1], [0, 0, 1, 1], [], []>} : vector<8x8xf32>, vector<8x8xf32>, vector<8x8xf32> -> vector<8x8xf32>
    %c8_47 = arith.constant 8 : index
    %c8_48 = arith.constant 8 : index
    %125 = vector.load %arg8[%c8_47, %c8_48] : memref<16x32xf32, #tpu.memory_space<vmem>>, vector<8x8xf32>
    tpu.vector_store %arg8[%c8_47, %c8_48], %124 {strides = array<i32>} : memref<16x32xf32, #tpu.memory_space<vmem>>, vector<8x8xf32>,
    %126 = vector.extract_strided_slice %13 {offsets = [8, 16], sizes = [8, 8], strides = [1, 1]} : vector<16x96xf32> to vector<8x8xf32>
    %127 = vector.extract_strided_slice %13 {offsets = [8, 48], sizes = [8, 8], strides = [1, 1]} : vector<16x96xf32> to vector<8x8xf32>
    %128 = vector.extract_strided_slice %13 {offsets = [8, 80], sizes = [8, 8], strides = [1, 1]} : vector<16x96xf32> to vector<8x8xf32>
    %cst_49 = arith.constant dense<0.000000e+00> : vector<8x8xf32>
    %129 = tpu.matmul %126, %127, %cst_49 {dimension_numbers = #tpu.dot_dimension_numbers<[1], [1], [0], [0], [0, 0, 1, 0], [], []>} : vector<8x8xf32>, vector<8x8xf32>, vector<8x8xf32> -> vector<8x8xf32>
    %cst_50 = arith.constant 0.353553385 : f32
    %130 = vector.broadcast %cst_50 : f32 to vector<8x8xf32>
    %131 = arith.mulf %129, %130 : vector<8x8xf32>
    %132 = arith.addf %131, %89 : vector<8x8xf32>
    %cst_51 = arith.constant dense<0xFF800000> : vector<8xf32>
    %133 = vector.multi_reduction <maximumf>, %132, %cst_51 [1] : vector<8x8xf32> to vector<8xf32>
    %134 = vector.shape_cast %133 : vector<8xf32> to vector<8x1xf32>
    %135 = vector.broadcast %134 : vector<8x1xf32> to vector<8x8xf32>
    %136 = arith.subf %132, %135 : vector<8x8xf32>
    %137 = math.exp %136 : vector<8x8xf32>
    %cst_52 = arith.constant dense<0.000000e+00> : vector<8xf32>
    %138 = vector.multi_reduction <add>, %137, %cst_52 [1] : vector<8x8xf32> to vector<8xf32>
    %139 = vector.shape_cast %138 : vector<8xf32> to vector<8x1xf32>
    %140 = vector.broadcast %139 : vector<8x1xf32> to vector<8x8xf32>
    %141 = arith.divf %137, %140 : vector<8x8xf32>
    %cst_53 = arith.constant dense<0.000000e+00> : vector<8x8xf32>
    %142 = tpu.matmul %141, %128, %cst_53 {dimension_numbers = #tpu.dot_dimension_numbers<[1], [0], [0], [1], [0, 0, 1, 1], [], []>} : vector<8x8xf32>, vector<8x8xf32>, vector<8x8xf32> -> vector<8x8xf32>
    %c8_54 = arith.constant 8 : index
    %c16_55 = arith.constant 16 : index
    %143 = vector.load %arg8[%c8_54, %c16_55] : memref<16x32xf32, #tpu.memory_space<vmem>>, vector<8x8xf32>
    tpu.vector_store %arg8[%c8_54, %c16_55], %142 {strides = array<i32>} : memref<16x32xf32, #tpu.memory_space<vmem>>, vector<8x8xf32>,
    %144 = vector.extract_strided_slice %13 {offsets = [8, 24], sizes = [8, 8], strides = [1, 1]} : vector<16x96xf32> to vector<8x8xf32>
    %145 = vector.extract_strided_slice %13 {offsets = [8, 56], sizes = [8, 8], strides = [1, 1]} : vector<16x96xf32> to vector<8x8xf32>
    %146 = vector.extract_strided_slice %13 {offsets = [8, 88], sizes = [8, 8], strides = [1, 1]} : vector<16x96xf32> to vector<8x8xf32>
    %cst_56 = arith.constant dense<0.000000e+00> : vector<8x8xf32>
    %147 = tpu.matmul %144, %145, %cst_56 {dimension_numbers = #tpu.dot_dimension_numbers<[1], [1], [0], [0], [0, 0, 1, 0], [], []>} : vector<8x8xf32>, vector<8x8xf32>, vector<8x8xf32> -> vector<8x8xf32>
    %cst_57 = arith.constant 0.353553385 : f32
    %148 = vector.broadcast %cst_57 : f32 to vector<8x8xf32>
    %149 = arith.mulf %147, %148 : vector<8x8xf32>
    %150 = arith.addf %149, %89 : vector<8x8xf32>
    %cst_58 = arith.constant dense<0xFF800000> : vector<8xf32>
    %151 = vector.multi_reduction <maximumf>, %150, %cst_58 [1] : vector<8x8xf32> to vector<8xf32>
    %152 = vector.shape_cast %151 : vector<8xf32> to vector<8x1xf32>
    %153 = vector.broadcast %152 : vector<8x1xf32> to vector<8x8xf32>
    %154 = arith.subf %150, %153 : vector<8x8xf32>
    %155 = math.exp %154 : vector<8x8xf32>
    %cst_59 = arith.constant dense<0.000000e+00> : vector<8xf32>
    %156 = vector.multi_reduction <add>, %155, %cst_59 [1] : vector<8x8xf32> to vector<8xf32>
    %157 = vector.shape_cast %156 : vector<8xf32> to vector<8x1xf32>
    %158 = vector.broadcast %157 : vector<8x1xf32> to vector<8x8xf32>
    %159 = arith.divf %155, %158 : vector<8x8xf32>
    %cst_60 = arith.constant dense<0.000000e+00> : vector<8x8xf32>
    %160 = tpu.matmul %159, %146, %cst_60 {dimension_numbers = #tpu.dot_dimension_numbers<[1], [0], [0], [1], [0, 0, 1, 1], [], []>} : vector<8x8xf32>, vector<8x8xf32>, vector<8x8xf32> -> vector<8x8xf32>
    %c8_61 = arith.constant 8 : index
    %c24_62 = arith.constant 24 : index
    %161 = vector.load %arg8[%c8_61, %c24_62] : memref<16x32xf32, #tpu.memory_space<vmem>>, vector<8x8xf32>
    tpu.vector_store %arg8[%c8_61, %c24_62], %160 {strides = array<i32>} : memref<16x32xf32, #tpu.memory_space<vmem>>, vector<8x8xf32>,
    %c0_63 = arith.constant 0 : index
    %c0_64 = arith.constant 0 : index
    %162 = vector.load %arg8[%c0_63, %c0_64] : memref<16x32xf32, #tpu.memory_space<vmem>>, vector<16x32xf32>
    %c0_65 = arith.constant 0 : index
    %c0_66 = arith.constant 0 : index
    %163 = vector.load %arg3[%c0_65, %c0_66] : memref<32x32xf32, #tpu.memory_space<vmem>>, vector<32x32xf32>
    %cst_67 = arith.constant dense<0.000000e+00> : vector<16x32xf32>
    %164 = tpu.matmul %162, %163, %cst_67 {dimension_numbers = #tpu.dot_dimension_numbers<[1], [0], [0], [1], [0, 0, 1, 1], [], []>} : vector<16x32xf32>, vector<32x32xf32>, vector<16x32xf32> -> vector<16x32xf32>
    %165 = vector.broadcast %3 : vector<1x32xf32> to vector<16x32xf32>
    %166 = arith.addf %164, %165 : vector<16x32xf32>
    %167 = arith.addf %0, %166 : vector<16x32xf32>
    %cst_68 = arith.constant dense<0.000000e+00> : vector<16xf32>
    %168 = vector.multi_reduction <add>, %167, %cst_68 [1] : vector<16x32xf32> to vector<16xf32>
    %169 = vector.shape_cast %168 : vector<16xf32> to vector<16x1xf32>
    %cst_69 = arith.constant 3.200000e+01 : f32
    %170 = vector.broadcast %cst_69 : f32 to vector<16x1xf32>
    %171 = arith.divf %169, %170 : vector<16x1xf32>
    %172 = vector.broadcast %171 : vector<16x1xf32> to vector<16x32xf32>
    %173 = arith.subf %167, %172 : vector<16x32xf32>
    %174 = arith.mulf %173, %173 : vector<16x32xf32>
    %cst_70 = arith.constant dense<0.000000e+00> : vector<16xf32>
    %175 = vector.multi_reduction <add>, %174, %cst_70 [1] : vector<16x32xf32> to vector<16xf32>
    %176 = vector.shape_cast %175 : vector<16xf32> to vector<16x1xf32>
    %cst_71 = arith.constant 3.200000e+01 : f32
    %177 = vector.broadcast %cst_71 : f32 to vector<16x1xf32>
    %178 = arith.divf %176, %177 : vector<16x1xf32>
    %179 = vector.broadcast %171 : vector<16x1xf32> to vector<16x32xf32>
    %180 = arith.subf %167, %179 : vector<16x32xf32>
    %cst_72 = arith.constant 9.99999974E-6 : f32
    %181 = vector.broadcast %cst_72 : f32 to vector<16x1xf32>
    %182 = arith.addf %178, %181 : vector<16x1xf32>
    %183 = math.rsqrt %182 : vector<16x1xf32>
    %184 = vector.broadcast %183 : vector<16x1xf32> to vector<16x32xf32>
    %185 = arith.mulf %180, %184 : vector<16x32xf32>
    %186 = vector.broadcast %4 : vector<1x32xf32> to vector<16x32xf32>
    %187 = arith.mulf %185, %186 : vector<16x32xf32>
    %188 = vector.broadcast %5 : vector<1x32xf32> to vector<16x32xf32>
    %189 = arith.addf %187, %188 : vector<16x32xf32>
    %c0_73 = arith.constant 0 : index
    %c0_74 = arith.constant 0 : index
    %190 = vector.load %arg4[%c0_73, %c0_74] : memref<32x128xf32, #tpu.memory_space<vmem>>, vector<32x128xf32>
    %cst_75 = arith.constant dense<0.000000e+00> : vector<16x128xf32>
    %191 = tpu.matmul %189, %190, %cst_75 {dimension_numbers = #tpu.dot_dimension_numbers<[1], [0], [0], [1], [0, 0, 1, 1], [], []>} : vector<16x32xf32>, vector<32x128xf32>, vector<16x128xf32> -> vector<16x128xf32>
    %192 = vector.broadcast %6 : vector<1x128xf32> to vector<16x128xf32>
    %193 = arith.addf %191, %192 : vector<16x128xf32>
    %cst_76 = arith.constant 0.000000e+00 : f32
    %194 = vector.broadcast %cst_76 : f32 to vector<16x128xf32>
    %195 = arith.maximumf %193, %194 : vector<16x128xf32>
    %c0_77 = arith.constant 0 : index
    %c0_78 = arith.constant 0 : index
    %196 = vector.load %arg5[%c0_77, %c0_78] : memref<128x32xf32, #tpu.memory_space<vmem>>, vector<128x32xf32>
    %cst_79 = arith.constant dense<0.000000e+00> : vector<16x32xf32>
    %197 = tpu.matmul %195, %196, %cst_79 {dimension_numbers = #tpu.dot_dimension_numbers<[1], [0], [0], [1], [0, 0, 1, 1], [], []>} : vector<16x128xf32>, vector<128x32xf32>, vector<16x32xf32> -> vector<16x32xf32>
    %198 = vector.broadcast %7 : vector<1x32xf32> to vector<16x32xf32>
    %199 = arith.addf %197, %198 : vector<16x32xf32>
    %200 = arith.addf %189, %199 : vector<16x32xf32>
    %cst_80 = arith.constant dense<0.000000e+00> : vector<16xf32>
    %201 = vector.multi_reduction <add>, %200, %cst_80 [1] : vector<16x32xf32> to vector<16xf32>
    %202 = vector.shape_cast %201 : vector<16xf32> to vector<16x1xf32>
    %cst_81 = arith.constant 3.200000e+01 : f32
    %203 = vector.broadcast %cst_81 : f32 to vector<16x1xf32>
    %204 = arith.divf %202, %203 : vector<16x1xf32>
    %205 = vector.broadcast %204 : vector<16x1xf32> to vector<16x32xf32>
    %206 = arith.subf %200, %205 : vector<16x32xf32>
    %207 = arith.mulf %206, %206 : vector<16x32xf32>
    %cst_82 = arith.constant dense<0.000000e+00> : vector<16xf32>
    %208 = vector.multi_reduction <add>, %207, %cst_82 [1] : vector<16x32xf32> to vector<16xf32>
    %209 = vector.shape_cast %208 : vector<16xf32> to vector<16x1xf32>
    %cst_83 = arith.constant 3.200000e+01 : f32
    %210 = vector.broadcast %cst_83 : f32 to vector<16x1xf32>
    %211 = arith.divf %209, %210 : vector<16x1xf32>
    %212 = vector.broadcast %204 : vector<16x1xf32> to vector<16x32xf32>
    %213 = arith.subf %200, %212 : vector<16x32xf32>
    %cst_84 = arith.constant 9.99999974E-6 : f32
    %214 = vector.broadcast %cst_84 : f32 to vector<16x1xf32>
    %215 = arith.addf %211, %214 : vector<16x1xf32>
    %216 = math.rsqrt %215 : vector<16x1xf32>
    %217 = vector.broadcast %216 : vector<16x1xf32> to vector<16x32xf32>
    %218 = arith.mulf %213, %217 : vector<16x32xf32>
    %219 = vector.broadcast %8 : vector<1x32xf32> to vector<16x32xf32>
    %220 = arith.mulf %218, %219 : vector<16x32xf32>
    %221 = vector.broadcast %9 : vector<1x32xf32> to vector<16x32xf32>
    %222 = arith.addf %220, %221 : vector<16x32xf32>
    %c0_85 = arith.constant 0 : index
    %c0_86 = arith.constant 0 : index
    %223 = vector.load %arg7[%c0_85, %c0_86] : memref<16x32xf32, #tpu.memory_space<vmem>>, vector<16x32xf32>
    tpu.vector_store %arg7[%c0_85, %c0_86], %222 {strides = array<i32>} : memref<16x32xf32, #tpu.memory_space<vmem>>, vector<16x32xf32>,
    return
  }
}

</mosaic_0001>

<bundles_post_ra>
// kernel: _lambda_.1
= control target key start
LH: loop header
LB: loop body
LE: loop exit
PB: predicated region body
PF: predicated region fallthrough
CT: control target
= control target key end

     0   :  { %12 = vsyncpa [#allocation4], 0  ;;  %s2725_s0 = inlined_call_operand.hbm [shape: f32[16,32], index: 0, kind: input, shape index: {}]   ;;  %s2726_s1 = inlined_call_operand.hbm [shape: f32[2,8,8], index: 1, kind: input, shape index: {}]   ;;  %s2727_s2 = inlined_call_operand.hbm [shape: f32[32,96], index: 2, kind: input, shape index: {}]   ;;  %s2728_s3 = inlined_call_operand.hbm [shape: f32[32,32], index: 3, kind: input, shape index: {}]   ;;  %s2729_s4 = inlined_call_operand.hbm [shape: f32[32,128], index: 4, kind: input, shape index: {}]   ;;  %s2730_s5 = inlined_call_operand.hbm [shape: f32[128,32], index: 5, kind: input, shape index: {}]   ;;  %s2731_s6 = inlined_call_operand.vmem [shape: f32[8,128], index: 6, kind: input, shape index: {}]   ;;  %s2732_s7 = inlined_call_operand.hbm [shape: f32[16,32], index: 7, kind: output, shape index: {}]  }
   0x1   :  { %13 = vsyncpa [#allocation7], 0 }
   0x2   :  { %14 = vsyncpa [#allocation10], 0 }
   0x3   :  { %15 = vsyncpa [#allocation13], 0 }
   0x4   :  { %16 = vsyncpa [#allocation5], 0  ;;  %s2415_s24 = smov [#allocation6]   ;;  %s2416_s26 = smov [#allocation9]  }
   0x5   :  { %s34_s25 = sshll.u32 %s2415_s24, 4  ;;  %s58_s27 = sshll.u32 %s2416_s26, 4  ;;  %s35_s25 = int_to_ptr.vmem [resolvable:$true] %s34_s25  ;;  %s59_s27 = int_to_ptr.vmem [resolvable:$true] %s58_s27 }
   0x6   :  { %s2273_s28 = scalar_lea.vmem %s35_s25, 256  ;;  %p2278_p1 = scmp.lt.s32.totalorder %s35_s25, %s35_s25 }
   0x7   :  { %p2274_p0 = scmp.ne.s32.totalorder %s35_s25, %s2273_s28  ;;  %p2279_p2 = scmp.lt.s32.totalorder %s2273_s28, %s2273_s28 }
   0x9   :  { %p2280_p3 = por %p2279_p2, %p2278_p1 }
   0xb   :  { %p2281_p4 = pnand %p2280_p3, %p2274_p0 }
   0xd   :  { %2284 = shalt.err (!%p2281_p4)
}
   0xe   :  { %s2417_s29 = smov 128   ;;  %s2418_s30 = smov 8  }
   0xf   :  { %40 = dma.hbm_to_vmem [thread:$0]  %s2726_s1, 256, %s35_s25, [#allocation7], %s2417_s29, %s2417_s29, %s2418_s30  }
  0x10   :  { %s2293_s10 = scalar_lea.vmem %s59_s27, 512  ;;  %p2298_p6 = scmp.lt.s32.totalorder %s59_s27, %s59_s27 }
  0x11   :  { %p2294_p5 = scmp.ne.s32.totalorder %s59_s27, %s2293_s10  ;;  %p2299_p7 = scmp.lt.s32.totalorder %s2293_s10, %s2293_s10 }
  0x13   :  { %p2300_p8 = por %p2299_p7, %p2298_p6 }
  0x15   :  { %p2301_p9 = pnand %p2300_p8, %p2294_p5 }
  0x17   :  { %2304 = shalt.err (!%p2301_p9)
}
  0x18   :  { %64 = dma.hbm_to_vmem [thread:$0]  %s2728_s3, 512, %s59_s27, [#allocation10], %s2417_s29, %s2417_s29, %s2418_s30  }
  0x19   :  { %s2419_s13 = smov [#allocation3]   ;;  %s2420_s15 = smov [#allocation8]  }
  0x1a   :  { %s22_s14 = sshll.u32 %s2419_s13, 4  ;;  %s46_s16 = sshll.u32 %s2420_s15, 4  ;;  %s23_s14 = int_to_ptr.vmem [resolvable:$true] %s22_s14  ;;  %s47_s16 = int_to_ptr.vmem [resolvable:$true] %s46_s16 }
  0x1b   :  { %s2313_s1 = scalar_lea.vmem %s23_s14, 256  ;;  %p2318_p11 = scmp.lt.s32.totalorder %s23_s14, %s23_s14 }
  0x1c   :  { %p2314_p10 = scmp.ne.s32.totalorder %s23_s14, %s2313_s1  ;;  %p2319_p12 = scmp.lt.s32.totalorder %s2313_s1, %s2313_s1 }
  0x1e   :  { %p2320_p13 = por %p2319_p12, %p2318_p11 }
  0x20   :  { %p2321_p0 = pnand %p2320_p13, %p2314_p10 }
  0x22   :  { %2324 = shalt.err (!%p2321_p0)
}
  0x23   :  { %28 = dma.hbm_to_vmem [thread:$0]  %s2725_s0, 256, %s23_s14, [#allocation4], %s2417_s29, %s2417_s29, %s2418_s30  }
  0x24   :  { %s2333_s3 = scalar_lea.vmem %s47_s16, 512  ;;  %p2338_p2 = scmp.lt.s32.totalorder %s47_s16, %s47_s16 }
  0x25   :  { %p2334_p1 = scmp.ne.s32.totalorder %s47_s16, %s2333_s3  ;;  %p2339_p3 = scmp.lt.s32.totalorder %s2333_s3, %s2333_s3 }
  0x27   :  { %p2340_p4 = por %p2339_p3, %p2338_p2 }
  0x29   :  { %p2341_p5 = pnand %p2340_p4, %p2334_p1 }
  0x2b   :  { %2344 = shalt.err (!%p2341_p5)
}
  0x2c   :  { %52 = dma.hbm_to_vmem [thread:$0]  %s2727_s2, 512, %s47_s16, [#allocation7], %s2417_s29, %s2417_s29, %s2418_s30  }
  0x2d   :  { %s2421_s21 = smov [#allocation11]   ;;  %s2422_s23 = smov [#allocation12]  }
  0x2e   :  { %s70_s22 = sshll.u32 %s2421_s21, 4  ;;  %s82_s24 = sshll.u32 %s2422_s23, 4  ;;  %s71_s22 = int_to_ptr.vmem [resolvable:$true] %s70_s22  ;;  %s83_s24 = int_to_ptr.vmem [resolvable:$true] %s82_s24 }
  0x2f   :  { %s2353_s0 = scalar_lea.vmem %s71_s22, 512  ;;  %p2358_p7 = scmp.lt.s32.totalorder %s71_s22, %s71_s22 }
  0x30   :  { %p2354_p6 = scmp.ne.s32.totalorder %s71_s22, %s2353_s0  ;;  %p2359_p8 = scmp.lt.s32.totalorder %s2353_s0, %s2353_s0 }
  0x32   :  { %p2360_p9 = por %p2359_p8, %p2358_p7 }
  0x34   :  { %p2361_p10 = pnand %p2360_p9, %p2354_p6 }
  0x36   :  { %2364 = shalt.err (!%p2361_p10)
}
  0x37   :  { %76 = dma.hbm_to_vmem [thread:$0]  %s2729_s4, 512, %s71_s22, [#allocation10], %s2417_s29, %s2417_s29, %s2418_s30  }
  0x38   :  { %s2373_s2 = scalar_lea.vmem %s83_s24, 2048  ;;  %p2378_p12 = scmp.lt.s32.totalorder %s83_s24, %s83_s24 }
  0x39   :  { %p2374_p11 = scmp.ne.s32.totalorder %s83_s24, %s2373_s2  ;;  %p2379_p13 = scmp.lt.s32.totalorder %s2373_s2, %s2373_s2 }
  0x3b   :  { %p2380_p0 = por %p2379_p13, %p2378_p12 }
  0x3d   :  { %p2381_p1 = pnand %p2380_p0, %p2374_p11 }
  0x3f   :  { %2384 = shalt.err (!%p2381_p1)
}
  0x40   :  { %88 = dma.hbm_to_vmem [thread:$0]  %s2730_s5, 2048, %s83_s24, [#allocation13], %s2417_s29, %s2417_s29, %s2418_s30  }
  0x41   :  { %2405 = dma.done.wait [#allocation4], 256  }
  0x42   :  { %2406 = vsyncadd [#allocation4], 4294967040 }
  0x43   :  { %2407 = dma.done.wait [#allocation7], 768  }
  0x44   :  { %2408 = vsyncadd [#allocation7], 4294966528 }
  0x45   :  { %2409 = dma.done.wait [#allocation10], 1024  }
  0x46   :  { %2410 = vsyncadd [#allocation10], 4294966272 }
  0x47   :  { %2411 = dma.done.wait [#allocation13], 2048  }
  0x48   :  { %2412 = vsyncadd [#allocation13], 4294965248  ;;  %vm120_vm0 = vcmask 261120   ;;  %v115_v0 = vld [vmem:[#allocation8 + $0x18] sm:$0xff]  ;;  %v114_v1 = vld [vmem:[#allocation8 + $0x10] sm:$0xff]  ;;  %v2423_v6 = vmov 0.0   ;;  %v116_v7 = vlaneseq }
  0x49   :  { %2053 = vmatprep.subr.mxu1 %v115_v0  ;;  %v2515_v2 = vld [vmem:[#allocation3] sm:$0xff]  ;;  %v113_v3 = vld [vmem:[#allocation8 + $0x8] sm:$0xff]  ;;  %2074 = vmatprep.subr.mxu0 %v2423_v6  ;;  %vm2424_vm1 = vmmov 0   ;;  %v2535_v10 = vld [vmem:[%s2731_s6] sm:$0xff]  ;;  %s2425_s8 = smov 120   ;;  %s2426_s9 = smov 96  }
  0x4a   :  { %2054 = vmatpush3.msra.mxu1 %v115_v0  ;;  %2061 = vmatprep.mubr.msk.f32.mxu1 %vm120_vm0, %v2515_v2  ;;  %v112_v4 = vld [vmem:[#allocation8] sm:$0xff]  ;;  %v2519_v5 = vld [vmem:[#allocation3 + $0x8] sm:$0xff]  ;;  %v2525_v8 = vshrl.u32 %v116_v7, 7  ;;  %s2427_s10 = smov 80   ;;  %s2428_s11 = smov 88   ;;  %vm206_vm2 = vcmask 64512  }
  0x4b   :  { %2055 = vmatprep.subr.mxu1 %v114_v1  ;;  %2076 = vmatprep.mubr.msk.f32.mxu0 %vm2424_vm1, %v2423_v6  ;;  %s2429_s6 = smov 72   ;;  %s2430_s12 = smov 112   ;;  %v202_v32 = vld [vmem:[#allocation6] sm:$0xff]  ;;  %v891_v52 = vld [vmem:[#allocation6 + $0x8] sm:$0xff]  ;;  %vm542_vm3 = vcmask 130112   ;;  %vm715_vm4 = vcmask 195712  }
  0x4c   :  { %2056 = vmatpush3.msra.mxu1 %v114_v1  ;;  %v118_v9 = vsub.s32 0, %v2525_v8  ;;  %s2431_s13 = smov 104   ;;  %s2432_s14 = smov 56   ;;  %vm888_vm5 = vcmask 261312  }
  0x4d   :  { %2057 = vmatprep.subr.mxu1 %v113_v3  ;;  %s2433_s15 = smov 64   ;;  %s2434_s16 = smov 40  }
  0x4e   :  { %2058 = vmatpush3.msra.mxu1 %v113_v3  ;;  %v119_v12 = vrot.slane %v2535_v10, %v118_v9  ;;  %s2435_s1 = smov 48   ;;  %s2436_s17 = smov 16  }
  0x4f   :  { %2059 = vmatprep.subr.mxu1 %v112_v4  ;;  %s2437_s18 = smov 24   ;;  %s2438_s3 = smov [#allocation14]  }
  0x50   :  { %2060 = vmatpush3.msra.mxu1 %v112_v4  ;;  %s1940_s19 = sshll.u32 %s2438_s3, 4  ;;  %s1941_s19 = int_to_ptr.vmem [resolvable:$true] %s1940_s19 }
  0x51   :  { %2062 = vmatmul.mubr.msk.f32.vlgmr.msra.gmra.mxu1 %vm120_vm0, %v2519_v5  ;;  %2064 = vmatprep.subr.mxu1 %v2423_v6  ;;  %s2385_s20 = scalar_lea.vmem %s1941_s19, 256  ;;  %p2390_p3 = scmp.lt.s32.totalorder %s1941_s19, %s1941_s19 }
  0x52   :  { %2066 = vmatprep.mubr.msk.f32.mxu1 %vm2424_vm1, %v2423_v6  ;;  %p2386_p2 = scmp.ne.s32.totalorder %s1941_s19, %s2385_s20  ;;  %p2391_p4 = scmp.lt.s32.totalorder %s2385_s20, %s2385_s20 }
  0x54   :  { %p2392_p5 = por %p2391_p4, %p2390_p3 }
  0x56   :  { %p2393_p6 = pnand %p2392_p5, %p2386_p2 }
 0x111   :  { %v2063_v11 = vpop.f32.mrf.mxu1 }
 0x112   :  { %v2546_v15 = vadd.f32 %v2063_v11, %v119_v12 }
 0x113   :  { %v193_v13 = vpop.f32.mrf.mxu1 }
 0x114   :  { %v2538_v14 = vadd.f32 %v193_v13, %v119_v12 }
 0x116   :  { %371 = vrot.lane.b32.xlu1 %v2538_v14, %s2425_s8  ;;  %204 = vrot.lane.b32.xlu0 %v2538_v14, %s2426_s9 }
 0x11a   :  { %546 = vrot.lane.b32.xlu1 %v2538_v14, %s2427_s10  ;;  %373 = vrot.lane.b32.xlu0 %v2538_v14, %s2428_s11 }
 0x11e   :  { %719 = vrot.lane.b32.xlu1 %v2538_v14, %s2429_s6  ;;  %544 = vrot.lane.b32.xlu0 %v2538_v14, %s2430_s12 }
 0x122   :  { %893 = vrot.lane.b32.xlu1 %v2546_v15, %s2426_s9  ;;  %717 = vrot.lane.b32.xlu0 %v2538_v14, %s2431_s13 }
 0x126   :  { %1059 = vrot.lane.b32.xlu1 %v2546_v15, %s2425_s8  ;;  %1061 = vrot.lane.b32.xlu0 %v2546_v15, %s2428_s11 }
 0x12a   :  { %1231 = vrot.lane.b32.xlu1 %v2546_v15, %s2430_s12  ;;  %1233 = vrot.lane.b32.xlu0 %v2546_v15, %s2427_s10 }
 0x12e   :  { %1403 = vrot.lane.b32.xlu1 %v2546_v15, %s2431_s13  ;;  %1405 = vrot.lane.b32.xlu0 %v2546_v15, %s2429_s6 }
 0x132   :  { %462 = vrot.lane.b32.xlu1 %v2538_v14, %s2432_s14  ;;  %294 = vrot.lane.b32.xlu0 %v2538_v14, %s2433_s15 }
 0x188   :  { %v372_v16 = vpop.permute.xlu1 %371  ;;  %v205_v17 = vpop.permute.xlu0 %204 }
 0x189   :  { %2065 = vmatpush3.xpose.msk.msra.mxu1 %vm206_vm2, %v205_v17 }
 0x18a   :  { %2069 = vmatprep.subr.mxu1 %v2423_v6 }
 0x18c   :  { %v547_v18 = vpop.permute.xlu1 %546  ;;  %2067 = vmatmul.mubr.msk.f32.vlgmr.msra.gmra.mxu1 %vm206_vm2, %v2538_v14  ;;  %v374_v19 = vpop.permute.xlu0 %373 }
 0x18d   :  { %2075 = vmatpush3.xpose.msk.msra.mxu0 %vm206_vm2, %v374_v19  ;;  %2071 = vmatprep.mubr.msk.f32.mxu1 %vm2424_vm1, %v2423_v6 }
 0x18e   :  { %2084 = vmatprep.subr.mxu0 %v2423_v6 }
 0x190   :  { %v720_v20 = vpop.permute.xlu1 %719  ;;  %2077 = vmatmul.mubr.msk.f32.vlgmr.msra.gmra.mxu0 %vm206_vm2, %v372_v16  ;;  %v545_v21 = vpop.permute.xlu0 %544 }
 0x191   :  { %2085 = vmatpush3.xpose.msk.msra.mxu0 %vm206_vm2, %v547_v18  ;;  %2086 = vmatprep.mubr.msk.f32.mxu0 %vm2424_vm1, %v2423_v6 }
 0x192   :  { %2094 = vmatprep.subr.mxu0 %v2423_v6 }
 0x194   :  { %2087 = vmatmul.mubr.msk.f32.vlgmr.msra.gmra.mxu0 %vm206_vm2, %v545_v21  ;;  %v718_v22 = vpop.permute.xlu0 %717  ;;  %v894_v23 = vpop.permute.xlu1 %893 }
 0x195   :  { %2095 = vmatpush3.xpose.msk.msra.mxu0 %vm206_vm2, %v720_v20  ;;  %2096 = vmatprep.mubr.msk.f32.mxu0 %vm2424_vm1, %v2423_v6 }
 0x196   :  { %2104 = vmatprep.subr.mxu0 %v2423_v6 }
 0x198   :  { %2097 = vmatmul.mubr.msk.f32.vlgmr.msra.gmra.mxu0 %vm206_vm2, %v718_v22  ;;  %v1062_v24 = vpop.permute.xlu0 %1061  ;;  %v1060_v25 = vpop.permute.xlu1 %1059 }
 0x199   :  { %2105 = vmatpush3.xpose.msk.msra.mxu0 %vm206_vm2, %v894_v23  ;;  %2106 = vmatprep.mubr.msk.f32.mxu0 %vm2424_vm1, %v2423_v6 }
 0x19a   :  { %2114 = vmatprep.subr.mxu0 %v2423_v6 }
 0x19c   :  { %2107 = vmatmul.mubr.msk.f32.vlgmr.msra.gmra.mxu0 %vm206_vm2, %v2546_v15  ;;  %v1234_v26 = vpop.permute.xlu0 %1233  ;;  %v1232_v28 = vpop.permute.xlu1 %1231 }
 0x19d   :  { %2115 = vmatpush3.xpose.msk.msra.mxu0 %vm206_vm2, %v1062_v24  ;;  %2116 = vmatprep.mubr.msk.f32.mxu0 %vm2424_vm1, %v2423_v6 }
 0x19e   :  { %2124 = vmatprep.subr.mxu0 %v2423_v6 }
 0x1a0   :  { %2117 = vmatmul.mubr.msk.f32.vlgmr.msra.gmra.mxu0 %vm206_vm2, %v1060_v25  ;;  %v1406_v27 = vpop.permute.xlu0 %1405  ;;  %v1404_v30 = vpop.permute.xlu1 %1403 }
 0x1a1   :  { %2125 = vmatpush3.xpose.msk.msra.mxu0 %vm206_vm2, %v1234_v26  ;;  %2126 = vmatprep.mubr.msk.f32.mxu0 %vm2424_vm1, %v2423_v6 }
 0x1a2   :  { %2134 = vmatprep.subr.mxu0 %v2423_v6 }
 0x1a4   :  { %2127 = vmatmul.mubr.msk.f32.vlgmr.msra.gmra.mxu0 %vm206_vm2, %v1232_v28  ;;  %v295_v29 = vpop.permute.xlu0 %294  ;;  %v2612_v16 = vpop.permute.xlu1 %462 }
 0x1a5   :  { %2070 = vmatpush3.msra.mxu1 %v295_v29  ;;  %2135 = vmatpush3.xpose.msk.msra.mxu0 %vm206_vm2, %v1406_v27 }
 0x1a6   :  { %2136 = vmatprep.mubr.msk.f32.mxu0 %vm2424_vm1, %v2423_v6  ;;  %2079 = vmatprep.subr.mxu1 %v2423_v6 }
 0x1a8   :  { %2137 = vmatmul.mubr.msk.f32.vlgmr.msra.gmra.mxu0 %vm206_vm2, %v1404_v30 }
 0x24c   :  { %v277_v31 = vpop.f32.mrf.mxu1 }
 0x24d   :  { %v281_v33 = vmul.f32 0.35355338, %v277_v31 }
 0x24e   :  { %v2068_v34 = vpop.f32.mrf.mxu1 }
 0x24f   :  { %v282_v35 = vadd.f32 %v281_v33, %v202_v32 }
 0x250   :  { %v445_v36 = vpop.f32.mrf.mxu0 }
 0x251   :  { %v449_v37 = vmul.f32 0.35355338, %v445_v36  ;;  %v283_v38 = vsel %vm206_vm2, %v282_v35, -inf }
 0x252   :  { %284 = vmax.xlane.f32.xlu0 %v283_v38  ;;  %v2078_v39 = vpop.f32.mrf.mxu0 }
 0x253   :  { %v450_v40 = vadd.f32 %v449_v37, %v202_v32 }
 0x254   :  { %v618_v41 = vpop.f32.mrf.mxu0 }
 0x255   :  { %v622_v42 = vmul.f32 0.35355338, %v618_v41  ;;  %v451_v43 = vsel %vm206_vm2, %v450_v40, -inf }
 0x256   :  { %452 = vmax.xlane.f32.xlu1 %v451_v43  ;;  %v2088_v44 = vpop.f32.mrf.mxu0 }
 0x257   :  { %v623_v45 = vadd.f32 %v622_v42, %v202_v32 }
 0x258   :  { %v791_v46 = vpop.f32.mrf.mxu0 }
 0x259   :  { %v795_v47 = vmul.f32 0.35355338, %v791_v46  ;;  %v624_v48 = vsel %vm206_vm2, %v623_v45, -inf }
 0x25a   :  { %625 = vmax.xlane.f32.xlu0 %v624_v48  ;;  %v2098_v49 = vpop.f32.mrf.mxu0 }
 0x25b   :  { %v796_v50 = vadd.f32 %v795_v47, %v202_v32 }
 0x25c   :  { %v965_v51 = vpop.f32.mrf.mxu0 }
 0x25d   :  { %v969_v53 = vmul.f32 0.35355338, %v965_v51  ;;  %v797_v54 = vsel %vm206_vm2, %v796_v50, -inf }
 0x25e   :  { %798 = vmax.xlane.f32.xlu0 %v797_v54  ;;  %v2108_v55 = vpop.f32.mrf.mxu0 }
 0x25f   :  { %v970_v56 = vadd.f32 %v969_v53, %v891_v52 }
 0x260   :  { %v1133_v57 = vpop.f32.mrf.mxu0 }
 0x261   :  { %v1137_v58 = vmul.f32 0.35355338, %v1133_v57  ;;  %v971_v59 = vsel %vm206_vm2, %v970_v56, -inf }
 0x262   :  { %972 = vmax.xlane.f32.xlu1 %v971_v59  ;;  %v2118_v60 = vpop.f32.mrf.mxu0 }
 0x263   :  { %v1138_v61 = vadd.f32 %v1137_v58, %v891_v52 }
 0x264   :  { %v1305_v62 = vpop.f32.mrf.mxu0 }
 0x265   :  { %v1309_v63 = vmul.f32 0.35355338, %v1305_v62  ;;  %v1139_v0 = vsel %vm206_vm2, %v1138_v61, -inf }
 0x266   :  { %1140 = vmax.xlane.f32.xlu0 %v1139_v0  ;;  %v2128_v1 = vpop.f32.mrf.mxu0 }
 0x267   :  { %v1310_v3 = vadd.f32 %v1309_v63, %v891_v52 }
 0x268   :  { %v1477_v4 = vpop.f32.mrf.mxu0 }
 0x269   :  { %v1481_v7 = vmul.f32 0.35355338, %v1477_v4  ;;  %v1311_v9 = vsel %vm206_vm2, %v1310_v3, -inf }
 0x26a   :  { %1312 = vmax.xlane.f32.xlu1 %v1311_v9  ;;  %v2138_v11 = vpop.f32.mrf.mxu0 }
 0x26b   :  { %v1482_v12 = vadd.f32 %v1481_v7, %v891_v52 }
 0x26d   :  { %v1483_v13 = vsel %vm206_vm2, %v1482_v12, -inf }
 0x26e   :  { %1484 = vmax.xlane.f32.xlu0 %v1483_v13 }
 0x27b   :  { %808 = vrot.lane.b32.xlu1 %v2538_v14, %s2434_s16 }
 0x284   :  { %635 = vrot.lane.b32.xlu0 %v2538_v14, %s2435_s1 }
 0x2db   :  { %v285_v17 = vpop.xlane.xlu0 %284 }
 0x2dc   :  { %v286_v18 = vsub.f32 %v282_v35, %v285_v17 }
 0x2de   :  { %v287_v19 = vmul.f32 1.442695, %v286_v18 }
 0x2df   :  { %v453_v20 = vpop.xlane.xlu1 %452 }
 0x2e0   :  { %2225 = vpow2.f32 %v287_v19  ;;  %v454_v21 = vsub.f32 %v450_v40, %v453_v20 }
 0x2e2   :  { %v455_v22 = vmul.f32 1.442695, %v454_v21 }
 0x2e3   :  { %v626_v23 = vpop.xlane.xlu0 %625 }
 0x2e4   :  { %2227 = vpow2.f32 %v455_v22  ;;  %v627_v24 = vsub.f32 %v623_v45, %v626_v23 }
 0x2e6   :  { %v628_v25 = vmul.f32 1.442695, %v627_v24 }
 0x2e7   :  { %v799_v26 = vpop.xlane.xlu0 %798 }
 0x2e8   :  { %2229 = vpow2.f32 %v628_v25  ;;  %v800_v27 = vsub.f32 %v796_v50, %v799_v26 }
 0x2ea   :  { %v801_v28 = vmul.f32 1.442695, %v800_v27 }
 0x2eb   :  { %v973_v36 = vpop.xlane.xlu1 %972 }
 0x2ec   :  { %2231 = vpow2.f32 %v801_v28  ;;  %v974_v37 = vsub.f32 %v970_v56, %v973_v36  ;;  %v1579_v36 = vld [vmem:[#allocation9 + $0x10] sm:$0xff] }
 0x2ed   :  { %v2226_v29 = vpop.eup %2225 }
 0x2ee   :  { %v289_v14 = vsel %vm206_vm2, %v2226_v29, 0.0  ;;  %v975_v41 = vmul.f32 1.442695, %v974_v37 }
 0x2ef   :  { %290 = vadd.xlane.f32.xlu1 %v289_v14  ;;  %v1141_v38 = vpop.xlane.xlu0 %1140 }
 0x2f0   :  { %v1142_v40 = vsub.f32 %v1138_v61, %v1141_v38  ;;  %2233 = vpow2.f32 %v975_v41  ;;  %v1578_v38 = vld [vmem:[#allocation9 + $0x8] sm:$0xff] }
 0x2f1   :  { %v2228_v30 = vpop.eup %2227 }
 0x2f2   :  { %v457_v31 = vsel %vm206_vm2, %v2228_v30, 0.0  ;;  %v1143_v44 = vmul.f32 1.442695, %v1142_v40  ;;  %v1577_v40 = vld [vmem:[#allocation9] sm:$0xff] }
 0x2f3   :  { %458 = vadd.xlane.f32.xlu0 %v457_v31  ;;  %v1313_v39 = vpop.xlane.xlu1 %1312 }
 0x2f4   :  { %v1314_v42 = vsub.f32 %v1310_v3, %v1313_v39  ;;  %2235 = vpow2.f32 %v1143_v44 }
 0x2f5   :  { %v2230_v32 = vpop.eup %2229 }
 0x2f6   :  { %v630_v33 = vsel %vm206_vm2, %v2230_v32, 0.0  ;;  %v1315_v45 = vmul.f32 1.442695, %v1314_v42 }
 0x2f7   :  { %631 = vadd.xlane.f32.xlu1 %v630_v33  ;;  %v1485_v43 = vpop.xlane.xlu0 %1484  ;;  %v809_v56 = vpop.permute.xlu1 %808 }
 0x2f8   :  { %v1486_v46 = vsub.f32 %v1482_v12, %v1485_v43  ;;  %2237 = vpow2.f32 %v1315_v45 }
 0x2f9   :  { %v2617_v34 = vpop.eup %2231 }
 0x2fa   :  { %v803_v35 = vsel %vm206_vm2, %v2617_v34, 0.0  ;;  %v1487_v47 = vmul.f32 1.442695, %v1486_v46 }
 0x2fb   :  { %804 = vadd.xlane.f32.xlu0 %v803_v35  ;;  %v636_v57 = vpop.permute.xlu0 %635  ;;  %v1580_v35 = vld [vmem:[#allocation9 + $0x18] sm:$0xff] }
 0x2fc   :  { %2239 = vpow2.f32 %v1487_v47 }
 0x2fd   :  { %v2234_v48 = vpop.eup %2233 }
 0x2fe   :  { %v977_v50 = vsel %vm206_vm2, %v2234_v48, 0.0 }
 0x301   :  { %v2625_v49 = vpop.eup %2235 }
 0x302   :  { %v1145_v53 = vsel %vm206_vm2, %v2625_v49, 0.0 }
 0x305   :  { %v2628_v51 = vpop.eup %2237 }
 0x306   :  { %v1317_v52 = vsel %vm206_vm2, %v2628_v51, 0.0 }
 0x308   :  { %1150 = vrot.lane.b32.xlu1 %v2546_v15, %s2432_s14 }
 0x309   :  { %v2634_v54 = vpop.eup %2239 }
 0x30a   :  { %v1489_v55 = vsel %vm206_vm2, %v2634_v54, 0.0 }
 0x311   :  { %982 = vrot.lane.b32.xlu0 %v2546_v15, %s2433_s15 }
 0x32c   :  { %978 = vadd.xlane.f32.xlu1 %v977_v50 }
 0x330   :  { %1318 = vadd.xlane.f32.xlu1 %v1317_v52  ;;  %1146 = vadd.xlane.f32.xlu0 %v1145_v53 }
 0x334   :  { %1490 = vadd.xlane.f32.xlu1 %v1489_v55 }
 0x345   :  { %1494 = vrot.lane.b32.xlu1 %v2546_v15, %s2434_s16 }
 0x346   :  { %1322 = vrot.lane.b32.xlu0 %v2546_v15, %s2435_s1 }
 0x378   :  { %v291_v58 = vpop.xlane.xlu1 %290 }
 0x379   :  { %2241 = vrcp.f32 %v291_v58 }
 0x37c   :  { %v459_v59 = vpop.xlane.xlu0 %458 }
 0x37d   :  { %2243 = vrcp.f32 %v459_v59 }
 0x380   :  { %v632_v60 = vpop.xlane.xlu1 %631 }
 0x381   :  { %2245 = vrcp.f32 %v632_v60 }
 0x384   :  { %v805_v61 = vpop.xlane.xlu0 %804  ;;  %v1151_v11 = vpop.permute.xlu1 %1150 }
 0x385   :  { %2247 = vrcp.f32 %v805_v61 }
 0x386   :  { %v2242_v62 = vpop.eup %2241 }
 0x387   :  { %v293_v63 = vmul.f32 %v2242_v62, %v2226_v29 }
 0x388   :  { %v983_v9 = vpop.permute.xlu0 %982 }
 0x389   :  { %2072 = vmatmul.mubr.msk.f32.vlgmr.msra.gmra.mxu1 %vm206_vm2, %v293_v63 }
 0x38a   :  { %v2244_v0 = vpop.eup %2243  ;;  %2080 = vmatpush3.msra.mxu1 %v2612_v16  ;;  %2081 = vmatprep.mubr.msk.f32.mxu1 %vm2424_vm1, %v2423_v6 }
 0x38b   :  { %2089 = vmatprep.subr.mxu1 %v2423_v6  ;;  %v461_v15 = vmul.f32 %v2244_v0, %v2228_v30 }
 0x38d   :  { %2082 = vmatmul.mubr.msk.f32.vlgmr.msra.gmra.mxu1 %vm206_vm2, %v461_v15 }
 0x38e   :  { %v2246_v1 = vpop.eup %2245  ;;  %2090 = vmatpush3.msra.mxu1 %v636_v57  ;;  %2091 = vmatprep.mubr.msk.f32.mxu1 %vm2424_vm1, %v2423_v6 }
 0x38f   :  { %2099 = vmatprep.subr.mxu1 %v2423_v6  ;;  %v634_v3 = vmul.f32 %v2246_v1, %v2230_v32 }
 0x391   :  { %2092 = vmatmul.mubr.msk.f32.vlgmr.msra.gmra.mxu1 %vm206_vm2, %v634_v3 }
 0x392   :  { %v2248_v4 = vpop.eup %2247  ;;  %2100 = vmatpush3.msra.mxu1 %v809_v56  ;;  %2101 = vmatprep.mubr.msk.f32.mxu1 %vm2424_vm1, %v2423_v6 }
 0x393   :  { %2109 = vmatprep.subr.mxu1 %v2423_v6  ;;  %v807_v7 = vmul.f32 %v2248_v4, %v2617_v34 }
 0x395   :  { %2102 = vmatmul.mubr.msk.f32.vlgmr.msra.gmra.mxu1 %vm206_vm2, %v807_v7 }
 0x396   :  { %2110 = vmatpush3.msra.mxu1 %v983_v9  ;;  %2111 = vmatprep.mubr.msk.f32.mxu1 %vm2424_vm1, %v2423_v6 }
 0x397   :  { %2119 = vmatprep.subr.mxu1 %v2423_v6 }
 0x3b5   :  { %v979_v12 = vpop.xlane.xlu1 %978 }
 0x3b6   :  { %2249 = vrcp.f32 %v979_v12  ;;  %v1710_v12 = vld [vmem:[#allocation11 + $0x18] sm:$0xff] }
 0x3b9   :  { %v1319_v13 = vpop.xlane.xlu1 %1318  ;;  %v1147_v16 = vpop.xlane.xlu0 %1146 }
 0x3ba   :  { %2251 = vrcp.f32 %v1147_v16  ;;  %v1708_v16 = vld [vmem:[#allocation11 + $0x8] sm:$0xff] }
 0x3bb   :  { %2253 = vrcp.f32 %v1319_v13  ;;  %v1709_v13 = vld [vmem:[#allocation11 + $0x10] sm:$0xff] }
 0x3bd   :  { %v1491_v17 = vpop.xlane.xlu1 %1490  ;;  %v1323_v23 = vpop.permute.xlu0 %1322 }
 0x3be   :  { %2255 = vrcp.f32 %v1491_v17  ;;  %v1707_v17 = vld [vmem:[#allocation11] sm:$0xff] }
 0x3c1   :  { %v1495_v26 = vpop.permute.xlu1 %1494 }
 0x3c3   :  { %v2250_v18 = vpop.eup %2249 }
 0x3c4   :  { %v981_v19 = vmul.f32 %v2250_v18, %v2234_v48  ;;  %v1813_v18 = vld [vmem:[#allocation12 + $0x78] sm:$0xff] }
 0x3c5   :  { %2166 = vmatprep.subr.mxu0 %v1813_v18 }
 0x3c6   :  { %2112 = vmatmul.mubr.msk.f32.vlgmr.msra.gmra.mxu1 %vm206_vm2, %v981_v19  ;;  %v1812_v19 = vld [vmem:[#allocation12 + $0x70] sm:$0xff]  ;;  %2167 = vmatpush3.msra.mxu0 %v1813_v18 }
 0x3c7   :  { %2120 = vmatpush3.msra.mxu1 %v1151_v11  ;;  %2121 = vmatprep.mubr.msk.f32.mxu1 %vm2424_vm1, %v2423_v6  ;;  %v2252_v20 = vpop.eup %2251 }
 0x3c8   :  { %2129 = vmatprep.subr.mxu1 %v2423_v6  ;;  %v1149_v21 = vmul.f32 %v2252_v20, %v2625_v49  ;;  %v2254_v22 = vpop.eup %2253  ;;  %v1811_v20 = vld [vmem:[#allocation12 + $0x68] sm:$0xff]  ;;  %2168 = vmatprep.subr.mxu0 %v1812_v19 }
 0x3c9   :  { %v1321_v24 = vmul.f32 %v2254_v22, %v2628_v51  ;;  %2169 = vmatpush3.msra.mxu0 %v1812_v19  ;;  %v1809_v22 = vld [vmem:[#allocation12 + $0x58] sm:$0xff] }
 0x3ca   :  { %2122 = vmatmul.mubr.msk.f32.vlgmr.msra.gmra.mxu1 %vm206_vm2, %v1149_v21  ;;  %v1810_v21 = vld [vmem:[#allocation12 + $0x60] sm:$0xff]  ;;  %2170 = vmatprep.subr.mxu0 %v1811_v20 }
 0x3cb   :  { %2130 = vmatpush3.msra.mxu1 %v1323_v23  ;;  %2131 = vmatprep.mubr.msk.f32.mxu1 %vm2424_vm1, %v2423_v6  ;;  %v2256_v25 = vpop.eup %2255  ;;  %v1808_v23 = vld [vmem:[#allocation12 + $0x50] sm:$0xff] }
 0x3cc   :  { %2139 = vmatprep.subr.mxu1 %v2423_v6  ;;  %v1493_v27 = vmul.f32 %v2256_v25, %v2634_v54  ;;  %v1583_v54 = vsub.s32 1, %v2525_v8  ;;  %2171 = vmatpush3.msra.mxu0 %v1811_v20  ;;  %v1806_v25 = vld [vmem:[#allocation12 + $0x40] sm:$0xff] }
 0x3cd   :  { %2172 = vmatprep.subr.mxu0 %v1810_v21 }
 0x3ce   :  { %2132 = vmatmul.mubr.msk.f32.vlgmr.msra.gmra.mxu1 %vm206_vm2, %v1321_v24  ;;  %v1584_v55 = vrot.slane %v2535_v10, %v1583_v54  ;;  %2173 = vmatpush3.msra.mxu0 %v1810_v21  ;;  %v1807_v24 = vld [vmem:[#allocation12 + $0x48] sm:$0xff] }
 0x3cf   :  { %2140 = vmatpush3.msra.mxu1 %v1495_v26  ;;  %2141 = vmatprep.mubr.msk.f32.mxu1 %vm2424_vm1, %v2423_v6  ;;  %v1805_v26 = vld [vmem:[#allocation12 + $0x38] sm:$0xff] }
 0x3d0   :  { %2144 = vmatprep.subr.mxu1 %v1580_v35  ;;  %2174 = vmatprep.subr.mxu0 %v1809_v22 }
 0x3d1   :  { %2175 = vmatpush3.msra.mxu0 %v1809_v22 }
 0x3d2   :  { %2142 = vmatmul.mubr.msk.f32.vlgmr.msra.gmra.mxu1 %vm206_vm2, %v1493_v27  ;;  %2176 = vmatprep.subr.mxu0 %v1808_v23  ;;  %v1804_v27 = vld [vmem:[#allocation12 + $0x30] sm:$0xff] }
 0x3d3   :  { %2145 = vmatpush3.msra.mxu1 %v1580_v35  ;;  %2177 = vmatpush3.msra.mxu0 %v1808_v23  ;;  %v1703_v35 = vsub.s32 3, %v2525_v8 }
 0x3d4   :  { %2146 = vmatprep.subr.mxu1 %v1579_v36  ;;  %2178 = vmatprep.subr.mxu0 %v1807_v24 }
 0x3d5   :  { %2147 = vmatpush3.msra.mxu1 %v1579_v36  ;;  %2179 = vmatpush3.msra.mxu0 %v1807_v24  ;;  %v1923_v24 = vsub.s32 6, %v2525_v8 }
 0x3d6   :  { %2148 = vmatprep.subr.mxu1 %v1578_v38  ;;  %2180 = vmatprep.subr.mxu0 %v1806_v25 }
 0x3d7   :  { %2149 = vmatpush3.msra.mxu1 %v1578_v38  ;;  %2181 = vmatpush3.msra.mxu0 %v1806_v25  ;;  %v1929_v25 = vsub.s32 7, %v2525_v8 }
 0x3d8   :  { %2150 = vmatprep.subr.mxu1 %v1577_v40  ;;  %2182 = vmatprep.subr.mxu0 %v1805_v26 }
 0x3d9   :  { %2151 = vmatpush3.msra.mxu1 %v1577_v40  ;;  %2183 = vmatpush3.msra.mxu0 %v1805_v26  ;;  %v1924_v26 = vrot.slane %v2535_v10, %v1923_v24 }
 0x3da   :  { %2155 = vmatprep.subr.mxu1 %v1710_v12  ;;  %2184 = vmatprep.subr.mxu0 %v1804_v27 }
 0x3db   :  { %2185 = vmatpush3.msra.mxu0 %v1804_v27 }
 0x449   :  { %v366_v28 = vpop.f32.mrf.mxu1 }
 0x44a   :  { %370 = vst.msk [vmem:[#allocation2] sm:$0xff] %vm206_vm2, %v366_v28  ;;  %v1803_v28 = vld [vmem:[#allocation12 + $0x28] sm:$0xff] }
 0x44b   :  { %v2073_v29 = vpop.f32.mrf.mxu1  ;;  %2186 = vmatprep.subr.mxu0 %v1803_v28 }
 0x44c   :  { %v1802_v29 = vld [vmem:[#allocation12 + $0x20] sm:$0xff]  ;;  %2187 = vmatpush3.msra.mxu0 %v1803_v28 }
 0x44d   :  { %v534_v14 = vpop.f32.mrf.mxu1  ;;  %2188 = vmatprep.subr.mxu0 %v1802_v29 }
 0x44e   :  { %539 = vrot.lane.b32.xlu0 %v534_v14, %s2418_s30  ;;  %2189 = vmatpush3.msra.mxu0 %v1802_v29  ;;  %v1930_v29 = vrot.slane %v2535_v10, %v1929_v25 }
 0x44f   :  { %v2083_v30 = vpop.f32.mrf.mxu1 }
 0x451   :  { %v707_v31 = vpop.f32.mrf.mxu1 }
 0x452   :  { %712 = vrot.lane.b32.xlu1 %v707_v31, %s2436_s17 }
 0x453   :  { %v2093_v32 = vpop.f32.mrf.mxu1 }
 0x455   :  { %v880_v33 = vpop.f32.mrf.mxu1 }
 0x456   :  { %885 = vrot.lane.b32.xlu1 %v880_v33, %s2437_s18 }
 0x457   :  { %v2103_v6 = vpop.f32.mrf.mxu1 }
 0x486   :  { %v1054_v34 = vpop.f32.mrf.mxu1 }
 0x487   :  { %1058 = vst.msk [vmem:[#allocation2 + $0x8] sm:$0xff] %vm206_vm2, %v1054_v34  ;;  %v1697_v34 = vsub.s32 2, %v2525_v8 }
 0x488   :  { %v2113_v37 = vpop.f32.mrf.mxu1 }
 0x489   :  { %v1698_v36 = vrot.slane %v2535_v10, %v1697_v34 }
 0x48a   :  { %v1222_v39 = vpop.f32.mrf.mxu1 }
 0x48b   :  { %1227 = vrot.lane.b32.xlu0 %v1222_v39, %s2418_s30  ;;  %v1704_v39 = vrot.slane %v2535_v10, %v1703_v35 }
 0x48c   :  { %v2123_v41 = vpop.f32.mrf.mxu1 }
 0x48e   :  { %v1394_v42 = vpop.f32.mrf.mxu1 }
 0x48f   :  { %1399 = vrot.lane.b32.xlu0 %v1394_v42, %s2436_s17 }
 0x490   :  { %v2133_v43 = vpop.f32.mrf.mxu1 }
 0x492   :  { %v1566_v44 = vpop.f32.mrf.mxu1 }
 0x493   :  { %1571 = vrot.lane.b32.xlu1 %v1566_v44, %s2437_s18 }
 0x494   :  { %v2143_v45 = vpop.f32.mrf.mxu1 }
 0x4c0   :  { %v540_v46 = vpop.permute.xlu0 %539 }
 0x4c1   :  { %543 = vst.msk [vmem:[#allocation2] sm:$0xff] %vm542_vm3, %v540_v46  ;;  %v1801_v46 = vld [vmem:[#allocation12 + $0x18] sm:$0xff] }
 0x4c2   :  { %2190 = vmatprep.subr.mxu0 %v1801_v46 }
 0x4c3   :  { %2191 = vmatpush3.msra.mxu0 %v1801_v46 }
 0x4c4   :  { %v713_v47 = vpop.permute.xlu1 %712 }
 0x4c5   :  { %716 = vst.msk [vmem:[#allocation2] sm:$0xff] %vm715_vm4, %v713_v47  ;;  %v1800_v47 = vld [vmem:[#allocation12 + $0x10] sm:$0xff] }
 0x4c6   :  { %2192 = vmatprep.subr.mxu0 %v1800_v47 }
 0x4c7   :  { %2193 = vmatpush3.msra.mxu0 %v1800_v47 }
 0x4c8   :  { %v886_v48 = vpop.permute.xlu1 %885 }
 0x4c9   :  { %889 = vst.msk [vmem:[#allocation2] sm:$0xff] %vm888_vm5, %v886_v48  ;;  %v1799_v48 = vld [vmem:[#allocation12 + $0x8] sm:$0xff] }
 0x4ca   :  { %2194 = vmatprep.subr.mxu0 %v1799_v48 }
 0x4cb   :  { %2195 = vmatpush3.msra.mxu0 %v1799_v48 }
 0x4d0   :  { %v1575_v49 = vld [vmem:[#allocation2] sm:$0xff] }
 0x4d1   :  { %2152 = vmatprep.mubr.msk.f32.mxu1 %vm120_vm0, %v1575_v49  ;;  %v1798_v49 = vld [vmem:[#allocation12] sm:$0xff] }
 0x4d2   :  { %2196 = vmatprep.subr.mxu0 %v1798_v49 }
 0x4d3   :  { %2197 = vmatpush3.msra.mxu0 %v1798_v49 }
 0x4fd   :  { %v1228_v50 = vpop.permute.xlu0 %1227 }
 0x4fe   :  { %1230 = vst.msk [vmem:[#allocation2 + $0x8] sm:$0xff] %vm542_vm3, %v1228_v50  ;;  %v1713_v50 = vsub.s32 4, %v2525_v8 }
 0x501   :  { %v1400_v51 = vpop.permute.xlu0 %1399 }
 0x502   :  { %1402 = vst.msk [vmem:[#allocation2 + $0x8] sm:$0xff] %vm715_vm4, %v1400_v51  ;;  %v1714_v51 = vrot.slane %v2535_v10, %v1713_v50 }
 0x505   :  { %v1572_v52 = vpop.permute.xlu1 %1571 }
 0x506   :  { %1574 = vst.msk [vmem:[#allocation2 + $0x8] sm:$0xff] %vm888_vm5, %v1572_v52 }
 0x50d   :  { %v1576_v53 = vld [vmem:[#allocation2 + $0x8] sm:$0xff] }
 0x50e   :  { %2153 = vmatmul.mubr.msk.f32.vlgmr.msra.gmra.mxu1 %vm120_vm0, %v1576_v53 }
 0x50f   :  { %2156 = vmatpush3.msra.mxu1 %v1710_v12 }
 0x510   :  { %2157 = vmatprep.subr.mxu1 %v1709_v13 }
 0x511   :  { %2158 = vmatpush3.msra.mxu1 %v1709_v13 }
 0x512   :  { %2159 = vmatprep.subr.mxu1 %v1708_v16 }
 0x513   :  { %2160 = vmatpush3.msra.mxu1 %v1708_v16 }
 0x514   :  { %2161 = vmatprep.subr.mxu1 %v1707_v17 }
 0x515   :  { %2162 = vmatpush3.msra.mxu1 %v1707_v17 }
 0x5ce   :  { %v2154_v56 = vpop.f32.mrf.mxu1 }
 0x5cf   :  { %v1663_v57 = vadd.f32 %v2154_v56, %v1584_v55 }
 0x5d0   :  { %v1657_v58 = vpop.f32.mrf.mxu1 }
 0x5d1   :  { %v1658_v59 = vadd.f32 %v1657_v58, %v1584_v55  ;;  %v1667_v60 = vadd.f32 %v1663_v57, %v2519_v5  ;;  %v1816_v58 = vsub.s32 5, %v2525_v8 }
 0x5d3   :  { %v1671_v61 = vsel %vm120_vm0, %v1667_v60, 0.0  ;;  %v1666_v62 = vadd.f32 %v1658_v59, %v2515_v2  ;;  %v1817_v59 = vrot.slane %v2535_v10, %v1816_v58 }
 0x5d4   :  { %1672 = vadd.xlane.f32.xlu1 %v1671_v61 }
 0x5d5   :  { %v1668_v63 = vsel %vm120_vm0, %v1666_v62, 0.0 }
 0x5d6   :  { %1669 = vadd.xlane.f32.xlu0 %v1668_v63 }
 0x65d   :  { %v1673_v0 = vpop.xlane.xlu1 %1672 }
 0x65e   :  { %v1676_v15 = vmul.f32 0.03125, %v1673_v0 }
 0x65f   :  { %v1670_v1 = vpop.xlane.xlu0 %1669 }
 0x660   :  { %v1675_v3 = vmul.f32 0.03125, %v1670_v1  ;;  %v2687_v4 = vsub.f32 %v1667_v60, %v1676_v15 }
 0x662   :  { %v2689_v7 = vsub.f32 %v1666_v62, %v1675_v3  ;;  %v1680_v2 = vmul.f32 %v2687_v4, %v2687_v4 }
 0x664   :  { %v1679_v9 = vmul.f32 %v2689_v7, %v2689_v7  ;;  %v1684_v11 = vsel %vm120_vm0, %v1680_v2, 0.0 }
 0x666   :  { %v1681_v5 = vsel %vm120_vm0, %v1679_v9, 0.0 }
 0x667   :  { %1682 = vadd.xlane.f32.xlu0 %v1681_v5 }
 0x66b   :  { %1685 = vadd.xlane.f32.xlu0 %v1684_v11 }
 0x6f0   :  { %v1683_v14 = vpop.xlane.xlu0 %1682 }
 0x6f1   :  { %v1687_v30 = vmul.f32 0.03125, %v1683_v14 }
 0x6f3   :  { %v1689_v31 = vadd.f32 1e-05, %v1687_v30 }
 0x6f4   :  { %v1686_v32 = vpop.xlane.xlu0 %1685 }
 0x6f5   :  { %2257 = vrsqrt.f32 %v1689_v31  ;;  %v1688_v33 = vmul.f32 0.03125, %v1686_v32 }
 0x6f7   :  { %v1690_v6 = vadd.f32 1e-05, %v1688_v33 }
 0x6f9   :  { %2259 = vrsqrt.f32 %v1690_v6 }
 0x702   :  { %v2258_v37 = vpop.eup %2257 }
 0x703   :  { %v1693_v38 = vmul.f32 %v2258_v37, %v2689_v7 }
 0x705   :  { %v1699_v40 = vmul.f32 %v1698_v36, %v1693_v38 }
 0x706   :  { %v2260_v41 = vpop.eup %2259 }
 0x707   :  { %v1694_v42 = vmul.f32 %v2260_v41, %v2687_v4  ;;  %v1705_v43 = vadd.f32 %v1704_v39, %v1699_v40 }
 0x709   :  { %v1700_v44 = vmul.f32 %v1698_v36, %v1694_v42  ;;  %2163 = vmatprep.mubr.msk.f32.mxu1 %vm120_vm0, %v1705_v43 }
 0x70b   :  { %v1706_v45 = vadd.f32 %v1704_v39, %v1700_v44 }
 0x70d   :  { %2164 = vmatmul.mubr.msk.f32.vlgmr.msra.gmra.mxu1 %vm120_vm0, %v1706_v45 }
 0x7cd   :  { %v2165_v52 = vpop.f32.mrf.mxu1 }
 0x7ce   :  { %v1793_v53 = vadd.f32 %v2165_v52, %v1714_v51 }
 0x7cf   :  { %v1787_v54 = vpop.f32.mrf.mxu1 }
 0x7d0   :  { %v1788_v55 = vadd.f32 %v1787_v54, %v1714_v51  ;;  %v1797_v57 = vmax.f32 %v1793_v53, 0.0 }
 0x7d2   :  { %v1796_v56 = vmax.f32 %v1788_v55, 0.0 }
 0x7d4   :  { %2198 = vmatprep.mubr.f32.mxu0 %v1796_v56 }
 0x7d5   :  { %2199 = vmatmul.mubr.f32.vlgmr.msra.gmra.mxu0 %v1797_v57 }
 0x895   :  { %v2200_v60 = vpop.f32.mrf.mxu0 }
 0x896   :  { %v1890_v61 = vadd.f32 %v2200_v60, %v1817_v59 }
 0x897   :  { %v1884_v62 = vpop.f32.mrf.mxu0 }
 0x898   :  { %v1885_v63 = vadd.f32 %v1884_v62, %v1817_v59  ;;  %v1894_v0 = vadd.f32 %v1890_v61, %v1706_v45 }
 0x89a   :  { %v1898_v15 = vsel %vm120_vm0, %v1894_v0, 0.0  ;;  %v1893_v1 = vadd.f32 %v1885_v63, %v1705_v43 }
 0x89b   :  { %1899 = vadd.xlane.f32.xlu0 %v1898_v15 }
 0x89c   :  { %v1895_v3 = vsel %vm120_vm0, %v1893_v1, 0.0 }
 0x89d   :  { %1896 = vadd.xlane.f32.xlu1 %v1895_v3 }
 0x924   :  { %v1900_v4 = vpop.xlane.xlu0 %1899 }
 0x925   :  { %v1902_v7 = vmul.f32 0.03125, %v1900_v4 }
 0x926   :  { %v1897_v9 = vpop.xlane.xlu1 %1896 }
 0x927   :  { %v1904_v5 = vsub.f32 %v1894_v0, %v1902_v7  ;;  %v1901_v2 = vmul.f32 0.03125, %v1897_v9 }
 0x929   :  { %v1903_v11 = vsub.f32 %v1893_v1, %v1901_v2  ;;  %v1906_v12 = vmul.f32 %v1904_v5, %v1904_v5 }
 0x92b   :  { %v1910_v13 = vsel %vm120_vm0, %v1906_v12, 0.0  ;;  %v1905_v16 = vmul.f32 %v1903_v11, %v1903_v11 }
 0x92c   :  { %1911 = vadd.xlane.f32.xlu0 %v1910_v13 }
 0x92d   :  { %v1907_v17 = vsel %vm120_vm0, %v1905_v16, 0.0 }
 0x92e   :  { %1908 = vadd.xlane.f32.xlu1 %v1907_v17 }
 0x9b5   :  { %v1912_v18 = vpop.xlane.xlu0 %1911 }
 0x9b6   :  { %v1914_v19 = vmul.f32 0.03125, %v1912_v18 }
 0x9b7   :  { %v1909_v20 = vpop.xlane.xlu1 %1908 }
 0x9b8   :  { %v1916_v21 = vadd.f32 1e-05, %v1914_v19  ;;  %v1913_v22 = vmul.f32 0.03125, %v1909_v20 }
 0x9ba   :  { %2261 = vrsqrt.f32 %v1916_v21  ;;  %v1915_v23 = vadd.f32 1e-05, %v1913_v22 }
 0x9bc   :  { %2263 = vrsqrt.f32 %v1915_v23 }
 0x9c7   :  { %v2262_v27 = vpop.eup %2261 }
 0x9c8   :  { %v1920_v28 = vmul.f32 %v2262_v27, %v1904_v5 }
 0x9c9   :  { %v2264_v14 = vpop.eup %2263 }
 0x9ca   :  { %v1919_v30 = vmul.f32 %v2264_v14, %v1903_v11  ;;  %v1926_v31 = vmul.f32 %v1924_v26, %v1920_v28 }
 0x9cc   :  { %v1925_v32 = vmul.f32 %v1924_v26, %v1919_v30  ;;  %v1932_v33 = vadd.f32 %v1930_v29, %v1926_v31 }
 0x9ce   :  { %v1931_v6 = vadd.f32 %v1930_v29, %v1925_v32  ;;  %1934 = vst.msk [vmem:[#allocation14 + $0x8] sm:$0xff] %vm120_vm0, %v1932_v33 }
 0x9d0   :  { %1933 = vst.msk [vmem:[#allocation14] sm:$0xff] %vm120_vm0, %v1931_v6 }
 0x9d1   :  { %2396 = shalt.err (!%p2393_p6)
}
 0x9d2   :  { %1946 = dma.vmem_to_hbm [thread:$0]  %s1941_s19, 256, %s2732_s7, [#allocation5], %s2417_s29, %s2417_s29, %s2418_s30  }
 0x9d3   :  { %2413 = dma.done.wait [#allocation5], 256  }
 0x9d4   :  { %2414 = vsyncadd [#allocation5], 4294967040 }
 0x9d5   :  { %1950 = vsyncpa [#allocation4], 1 }
 0x9d6   :  { %1951 = vsyncpa [#allocation7], 1 }
 0x9d7   :  { %1952 = vsyncpa [#allocation10], 1 }
 0x9d8   :  { %1953 = vsyncpa [#allocation13], 1 }
 0x9d9   :  { %1954 = vsyncpa [#allocation5], 1 }

</bundles_post_ra>
